<compile_context>
chip_gen: v7x
topology: tpu7x:2x2x1
jax: 0.10.0
libtpu: 0.0.40
codegen_flags: <defaults>
</compile_context>

<pallas_src>
import jax
import jax.numpy as jnp
from jax.experimental import pallas as pl
from jax.experimental.pallas import tpu as pltpu


def _round_up(x, m):
    return ((x + m - 1) // m) * m


_MIN_TB = 16     # bf16 packs 2 rows/sublane: 16-row tiles keep loads/stores full-width
_MAX_TB = 2048   # VMEM clamp: ~19 MiB/step at tb=2048, safe even on v7x (64 MiB)


# ----------------------------------------------------------------------------
# Fused autoencoder MLP kernel: 4 matmuls + bias + ReLU (eval-BN pre-folded).
# ----------------------------------------------------------------------------
def _ae_kernel(x_ref,
               w1_ref, b1_ref,
               w2_ref, b2_ref,
               w3_ref, b3_ref,
               w4_ref, b4_ref,
               enc_ref, dec_ref):
    x = x_ref[...]                                            # bf16 (TB, D_pad)

    # encoder: Linear -> ReLU
    h = jnp.dot(x, w1_ref[...], preferred_element_type=jnp.float32) + b1_ref[...]
    h = jnp.maximum(h, 0.0)

    # encoder: [BN+Dropout folded into w2/b2] Linear -> ReLU  (== `encoded`)
    enc = jnp.dot(h.astype(jnp.bfloat16), w2_ref[...],
                  preferred_element_type=jnp.float32) + b2_ref[...]
    enc = jnp.maximum(enc, 0.0)
    enc_ref[...] = enc.astype(enc_ref.dtype)                  # bf16 writeback

    # decoder: Linear -> ReLU
    d = jnp.dot(enc.astype(jnp.bfloat16), w3_ref[...],
                preferred_element_type=jnp.float32) + b3_ref[...]
    d = jnp.maximum(d, 0.0)

    # decoder: [BN+Dropout folded into w4/b4] final Linear
    dec = jnp.dot(d.astype(jnp.bfloat16), w4_ref[...],
                  preferred_element_type=jnp.float32) + b4_ref[...]
    dec_ref[...] = dec.astype(dec_ref.dtype)                  # bf16 writeback


# ----------------------------------------------------------------------------
# One-time parameter prep: fold eval-mode BN into the following Linear,
# zero-pad the feature dim to a lane-dense multiple of 128, cast to bf16.
# ----------------------------------------------------------------------------
def prepare_params(params, input_dim, eps=1e-5):
    D = input_dim
    D_pad = _round_up(D, 128)   # keep at 128: padding to 256 would only add dead work

    s1 = params["bn1_gamma"] / jnp.sqrt(params["bn1_var"] + eps)
    t1 = params["bn1_beta"] - params["bn1_mean"] * s1
    s2 = params["bn2_gamma"] / jnp.sqrt(params["bn2_var"] + eps)
    t2 = params["bn2_beta"] - params["bn2_mean"] * s2

    w2 = params["w2"] * s1[:, None]
    b2 = params["b2"] + t1 @ params["w2"]
    w4 = params["w4"] * s2[:, None]
    b4 = params["b4"] + t2 @ params["w4"]

    w1p = jnp.pad(params["w1"], ((0, D_pad - D), (0, 0)))
    w4p = jnp.pad(w4, ((0, 0), (0, D_pad - D)))
    b4p = jnp.pad(b4, ((0, D_pad - D),))

    bf = lambda a: a.astype(jnp.bfloat16)
    row = lambda a: a[None, :].astype(jnp.float32)
    return dict(
        w1=bf(w1p), b1=row(params["b1"]),
        w2=bf(w2),  b2=row(b2),
        w3=bf(params["w3"]), b3=row(params["b3"]),
        w4=bf(w4p), b4=row(b4p),
    )


# ----------------------------------------------------------------------------
# Forward: batch-tiled pallas_call + tiny output heads.
# ----------------------------------------------------------------------------
def mixed_autoencoder_forward(x, prepped, cont_idx, ord_idx, ohe_groups,
                              tile_b=1024):
    B, D = x.shape
    D_pad, H0 = prepped["w1"].shape
    H1 = prepped["w2"].shape[1]

    # ---- Batch-tile selection: 16-row aligned, VMEM-clamped, >= 2 steps. ----
    tb = _round_up(max(_MIN_TB, min(int(tile_b), _MAX_TB)), _MIN_TB)
    tb = min(tb, _round_up(B, _MIN_TB))
    if B > _MIN_TB and pl.cdiv(B, tb) < 2:
        # v7x megacore: make sure both TensorCores get at least one row-tile.
        tb = _round_up(pl.cdiv(B, 2), _MIN_TB)
    B_pad = _round_up(B, tb)
    n_tiles = B_pad // tb

    # ---- Pad x in bf16 (no f32 staging copy). ----
    xp = jnp.pad(x.astype(jnp.bfloat16), ((0, B_pad - B), (0, D_pad - D)))

    def row_spec(cols):
        return pl.BlockSpec((tb, cols), lambda i: (i, 0))

    def const_spec(shape):
        return pl.BlockSpec(shape, lambda i: (0, 0))

    encoded, decoded = pl.pallas_call(
        _ae_kernel,
        grid=(n_tiles,),
        in_specs=[
            row_spec(D_pad),                                  # x (moves with grid)
            const_spec((D_pad, H0)), const_spec((1, H0)),     # w1, b1 (VMEM-resident)
            const_spec((H0, H1)),    const_spec((1, H1)),     # w2', b2'
            const_spec((H1, H0)),    const_spec((1, H0)),     # w3, b3
            const_spec((H0, D_pad)), const_spec((1, D_pad)),  # w4', b4'
        ],
        out_specs=(row_spec(H1), row_spec(D_pad)),
        out_shape=(
            jax.ShapeDtypeStruct((B_pad, H1), jnp.bfloat16),
            jax.ShapeDtypeStruct((B_pad, D_pad), jnp.bfloat16),
        ),
        compiler_params=pltpu.CompilerParams(
            dimension_semantics=("parallel",),
            vmem_limit_bytes=40 * 1024 * 1024,   # < 64 MiB v7x physical ceiling
        ),
    )(xp,
      prepped["w1"], prepped["b1"], prepped["w2"], prepped["b2"],
      prepped["w3"], prepped["b3"], prepped["w4"], prepped["b4"])

    encoded = encoded[:B]                 # bf16; upcast outside if f32 is needed
    decoded = decoded[:B, :D]

    # ---- Output heads: tiny gathers + elementwise; plain-JAX glue (XLA fuses
    #      these; real CSV-derived index sets may be non-contiguous). ----
    cont = decoded[:, jnp.asarray(cont_idx)].astype(jnp.float32)
    ordn = jax.nn.sigmoid(decoded[:, jnp.asarray(ord_idx)].astype(jnp.float32))
    ohe = {g: jax.nn.softmax(decoded[:, jnp.asarray(idx)].astype(jnp.float32), axis=1)
           for g, idx in ohe_groups.items()}

    outputs = {"continuous": cont, "ordinal": ordn, "ohe": ohe}
    return outputs, encoded


# ----------------------------------------------------------------------------
# Pure-JAX f32 reference of the eval-mode PyTorch forward (for checking).
# ----------------------------------------------------------------------------
def reference_forward(x, params, eps=1e-5):
    def bn(h, g, b, m, v):
        return (h - m) / jnp.sqrt(v + eps) * g + b

    h = jnp.maximum(x @ params["w1"] + params["b1"], 0.0)
    h = bn(h, params["bn1_gamma"], params["bn1_beta"],
           params["bn1_mean"], params["bn1_var"])
    enc = jnp.maximum(h @ params["w2"] + params["b2"], 0.0)
    d = jnp.maximum(enc @ params["w3"] + params["b3"], 0.0)
    d = bn(d, params["bn2_gamma"], params["bn2_beta"],
           params["bn2_mean"], params["bn2_var"])
    dec = d @ params["w4"] + params["b4"]
    return dec, enc


# ----------------------------------------------------------------------------
# Deterministic parameter init (matches PyTorch module __init__ shapes).
# Non-trivial BN stats so the BN-fold path is actually exercised.
# ----------------------------------------------------------------------------
def init_params(key, input_dim, hidden_dims=(512, 384, 256)):
    h0, h1 = hidden_dims[0], hidden_dims[1]
    ks = jax.random.split(key, 16)

    def linear(kw, kb, fan_in, fan_out):
        bound = 1.0 / (fan_in ** 0.5)
        w = jax.random.uniform(kw, (fan_in, fan_out), jnp.float32, -bound, bound)
        b = jax.random.uniform(kb, (fan_out,), jnp.float32, -bound, bound)
        return w, b

    w1, b1 = linear(ks[0], ks[1], input_dim, h0)
    w2, b2 = linear(ks[2], ks[3], h0, h1)
    w3, b3 = linear(ks[4], ks[5], h1, h0)
    w4, b4 = linear(ks[6], ks[7], h0, input_dim)

    def bn_stats(kg, kb, km, kv, n):
        return (jax.random.uniform(kg, (n,), jnp.float32, 0.8, 1.2),
                0.1 * jax.random.normal(kb, (n,), jnp.float32),
                0.1 * jax.random.normal(km, (n,), jnp.float32),
                jax.random.uniform(kv, (n,), jnp.float32, 0.5, 1.5))

    g1, be1, m1, v1 = bn_stats(ks[8], ks[9], ks[10], ks[11], h0)
    g2, be2, m2, v2 = bn_stats(ks[12], ks[13], ks[14], ks[15], h0)
    return dict(
        w1=w1, b1=b1, w2=w2, b2=b2, w3=w3, b3=b3, w4=w4, b4=b4,
        bn1_gamma=g1, bn1_beta=be1, bn1_mean=m1, bn1_var=v1,
        bn2_gamma=g2, bn2_beta=be2, bn2_mean=m2, bn2_var=v2,
    )


if __name__ == "__main__":
    B, D = 32, 64
    # Deterministic synthetic column groupings (CSV-derived ones unavailable).
    cont_idx = list(range(0, 10))
    ord_idx = list(range(10, 30))
    ohe_groups = {"QS_A": list(range(30, 36)), "QS_B": list(range(36, 41))}

    key = jax.random.PRNGKey(0)
    kx, kp = jax.random.split(key)
    x = jax.random.normal(kx, (B, D), jnp.float32)
    params = init_params(kp, D)
    prepped = prepare_params(params, D)   # one-time prep (BN fold / pad / bf16)

    # Default tile_b=1024 collapses to two 16-row tiles here, exercising the
    # multi-step / megacore-parallel batch tiling even at this demo size.
    outputs, encoded = mixed_autoencoder_forward(
        x, params=prepped, cont_idx=cont_idx, ord_idx=ord_idx,
        ohe_groups=ohe_groups) if False else mixed_autoencoder_forward(
        x, prepped, cont_idx, ord_idx, ohe_groups)
    jax.block_until_ready((outputs, encoded))

    # Shape / sanity checks.
    assert encoded.shape == (B, 384)
    assert outputs["continuous"].shape == (B, len(cont_idx))
    assert outputs["ordinal"].shape == (B, len(ord_idx))
    assert all(outputs["ohe"][g].shape == (B, len(idx))
               for g, idx in ohe_groups.items())
    assert bool(jnp.all(jnp.isfinite(encoded.astype(jnp.float32))))
    assert bool(jnp.all(jnp.isfinite(outputs["continuous"])))

    # Numerical check vs. f32 reference (bf16 operands -> loose tolerance).
    dec_r, enc_r = reference_forward(x, params)
    enc_err = float(jnp.max(jnp.abs(encoded.astype(jnp.float32) - enc_r))
                    / (jnp.max(jnp.abs(enc_r)) + 1e-6))
    cont_err = float(jnp.max(jnp.abs(outputs["continuous"]
                                     - dec_r[:, jnp.asarray(cont_idx)]))
                     / (jnp.max(jnp.abs(dec_r)) + 1e-6))
    assert enc_err < 0.1, f"encoded mismatch: rel-to-max err {enc_err}"
    assert cont_err < 0.1, f"decoded mismatch: rel-to-max err {cont_err}"

    print("KERNEL_OK")
</pallas_src>

<mosaic_0001>
module attributes {stable_mosaic.version = 11 : i64} {
  func.func @_ae_kernel(%arg0: i32, %arg1: memref<16x128xbf16, #tpu.memory_space<vmem>>, %arg2: memref<128x512xbf16, #tpu.memory_space<vmem>>, %arg3: memref<1x512xf32, #tpu.memory_space<vmem>>, %arg4: memref<512x384xbf16, #tpu.memory_space<vmem>>, %arg5: memref<1x384xf32, #tpu.memory_space<vmem>>, %arg6: memref<384x512xbf16, #tpu.memory_space<vmem>>, %arg7: memref<1x512xf32, #tpu.memory_space<vmem>>, %arg8: memref<512x128xbf16, #tpu.memory_space<vmem>>, %arg9: memref<1x128xf32, #tpu.memory_space<vmem>>, %arg10: memref<16x384xbf16, #tpu.memory_space<vmem>>, %arg11: memref<16x128xbf16, #tpu.memory_space<vmem>>) attributes {dimension_semantics = [#tpu.dimension_semantics<parallel>], iteration_bounds = array<i64: 2>, scalar_prefetch = 0 : i64, scratch_operands = 0 : i64, tpu.core_type = #tpu.core_type<tc>, window_params = [{transform_indices = @transform_0, window_bounds = array<i64: 16, 128>}, {pipeline_mode = #tpu.pipeline_mode<synchronous>, transform_indices = @transform_1, window_bounds = array<i64: 128, 512>}, {pipeline_mode = #tpu.pipeline_mode<synchronous>, transform_indices = @transform_2, window_bounds = array<i64: 1, 512>}, {pipeline_mode = #tpu.pipeline_mode<synchronous>, transform_indices = @transform_3, window_bounds = array<i64: 512, 384>}, {pipeline_mode = #tpu.pipeline_mode<synchronous>, transform_indices = @transform_4, window_bounds = array<i64: 1, 384>}, {pipeline_mode = #tpu.pipeline_mode<synchronous>, transform_indices = @transform_5, window_bounds = array<i64: 384, 512>}, {pipeline_mode = #tpu.pipeline_mode<synchronous>, transform_indices = @transform_6, window_bounds = array<i64: 1, 512>}, {pipeline_mode = #tpu.pipeline_mode<synchronous>, transform_indices = @transform_7, window_bounds = array<i64: 512, 128>}, {pipeline_mode = #tpu.pipeline_mode<synchronous>, transform_indices = @transform_8, window_bounds = array<i64: 1, 128>}, {transform_indices = @transform_9, window_bounds = array<i64: 16, 384>}, {transform_indices = @transform_10, window_bounds = array<i64: 16, 128>}]} {
    %c0 = arith.constant 0 : index
    %c0_0 = arith.constant 0 : index
    %0 = vector.load %arg1[%c0, %c0_0] : memref<16x128xbf16, #tpu.memory_space<vmem>>, vector<16x128xbf16>
    %c0_1 = arith.constant 0 : index
    %c0_2 = arith.constant 0 : index
    %1 = vector.load %arg2[%c0_1, %c0_2] : memref<128x512xbf16, #tpu.memory_space<vmem>>, vector<128x512xbf16>
    %cst = arith.constant dense<0.000000e+00> : vector<16x512xf32>
    %2 = tpu.matmul %0, %1, %cst {dimension_numbers = #tpu.dot_dimension_numbers<[1], [0], [0], [1], [0, 0, 1, 1], [], []>} : vector<16x128xbf16>, vector<128x512xbf16>, vector<16x512xf32> -> vector<16x512xf32>
    %c0_3 = arith.constant 0 : index
    %c0_4 = arith.constant 0 : index
    %3 = vector.load %arg3[%c0_3, %c0_4] : memref<1x512xf32, #tpu.memory_space<vmem>>, vector<1x512xf32>
    %4 = vector.broadcast %3 : vector<1x512xf32> to vector<16x512xf32>
    %5 = arith.addf %2, %4 : vector<16x512xf32>
    %cst_5 = arith.constant 0.000000e+00 : f32
    %6 = vector.broadcast %cst_5 : f32 to vector<16x512xf32>
    %7 = arith.maximumf %5, %6 : vector<16x512xf32>
    %8 = arith.truncf %7 : vector<16x512xf32> to vector<16x512xbf16>
    %c0_6 = arith.constant 0 : index
    %c0_7 = arith.constant 0 : index
    %9 = vector.load %arg4[%c0_6, %c0_7] : memref<512x384xbf16, #tpu.memory_space<vmem>>, vector<512x384xbf16>
    %cst_8 = arith.constant dense<0.000000e+00> : vector<16x384xf32>
    %10 = tpu.matmul %8, %9, %cst_8 {dimension_numbers = #tpu.dot_dimension_numbers<[1], [0], [0], [1], [0, 0, 1, 1], [], []>} : vector<16x512xbf16>, vector<512x384xbf16>, vector<16x384xf32> -> vector<16x384xf32>
    %c0_9 = arith.constant 0 : index
    %c0_10 = arith.constant 0 : index
    %11 = vector.load %arg5[%c0_9, %c0_10] : memref<1x384xf32, #tpu.memory_space<vmem>>, vector<1x384xf32>
    %12 = vector.broadcast %11 : vector<1x384xf32> to vector<16x384xf32>
    %13 = arith.addf %10, %12 : vector<16x384xf32>
    %cst_11 = arith.constant 0.000000e+00 : f32
    %14 = vector.broadcast %cst_11 : f32 to vector<16x384xf32>
    %15 = arith.maximumf %13, %14 : vector<16x384xf32>
    %16 = arith.truncf %15 : vector<16x384xf32> to vector<16x384xbf16>
    %c0_12 = arith.constant 0 : index
    %c0_13 = arith.constant 0 : index
    %17 = vector.load %arg10[%c0_12, %c0_13] : memref<16x384xbf16, #tpu.memory_space<vmem>>, vector<16x384xbf16>
    tpu.vector_store %arg10[%c0_12, %c0_13], %16 {strides = array<i32>} : memref<16x384xbf16, #tpu.memory_space<vmem>>, vector<16x384xbf16>,
    %18 = arith.truncf %15 : vector<16x384xf32> to vector<16x384xbf16>
    %c0_14 = arith.constant 0 : index
    %c0_15 = arith.constant 0 : index
    %19 = vector.load %arg6[%c0_14, %c0_15] : memref<384x512xbf16, #tpu.memory_space<vmem>>, vector<384x512xbf16>
    %cst_16 = arith.constant dense<0.000000e+00> : vector<16x512xf32>
    %20 = tpu.matmul %18, %19, %cst_16 {dimension_numbers = #tpu.dot_dimension_numbers<[1], [0], [0], [1], [0, 0, 1, 1], [], []>} : vector<16x384xbf16>, vector<384x512xbf16>, vector<16x512xf32> -> vector<16x512xf32>
    %c0_17 = arith.constant 0 : index
    %c0_18 = arith.constant 0 : index
    %21 = vector.load %arg7[%c0_17, %c0_18] : memref<1x512xf32, #tpu.memory_space<vmem>>, vector<1x512xf32>
    %22 = vector.broadcast %21 : vector<1x512xf32> to vector<16x512xf32>
    %23 = arith.addf %20, %22 : vector<16x512xf32>
    %cst_19 = arith.constant 0.000000e+00 : f32
    %24 = vector.broadcast %cst_19 : f32 to vector<16x512xf32>
    %25 = arith.maximumf %23, %24 : vector<16x512xf32>
    %26 = arith.truncf %25 : vector<16x512xf32> to vector<16x512xbf16>
    %c0_20 = arith.constant 0 : index
    %c0_21 = arith.constant 0 : index
    %27 = vector.load %arg8[%c0_20, %c0_21] : memref<512x128xbf16, #tpu.memory_space<vmem>>, vector<512x128xbf16>
    %cst_22 = arith.constant dense<0.000000e+00> : vector<16x128xf32>
    %28 = tpu.matmul %26, %27, %cst_22 {dimension_numbers = #tpu.dot_dimension_numbers<[1], [0], [0], [1], [0, 0, 1, 1], [], []>} : vector<16x512xbf16>, vector<512x128xbf16>, vector<16x128xf32> -> vector<16x128xf32>
    %c0_23 = arith.constant 0 : index
    %c0_24 = arith.constant 0 : index
    %29 = vector.load %arg9[%c0_23, %c0_24] : memref<1x128xf32, #tpu.memory_space<vmem>>, vector<1x128xf32>
    %30 = vector.broadcast %29 : vector<1x128xf32> to vector<16x128xf32>
    %31 = arith.addf %28, %30 : vector<16x128xf32>
    %32 = arith.truncf %31 : vector<16x128xf32> to vector<16x128xbf16>
    %c0_25 = arith.constant 0 : index
    %c0_26 = arith.constant 0 : index
    %33 = vector.load %arg11[%c0_25, %c0_26] : memref<16x128xbf16, #tpu.memory_space<vmem>>, vector<16x128xbf16>
    tpu.vector_store %arg11[%c0_25, %c0_26], %32 {strides = array<i32>} : memref<16x128xbf16, #tpu.memory_space<vmem>>, vector<16x128xbf16>,
    return
  }
  func.func @transform_0(%arg0: i32) -> (i32, i32) {
    %c0_i32 = arith.constant 0 : i32
    %c0_i32_0 = arith.constant 0 : i32
    return %arg0, %c0_i32 : i32, i32
  }
  func.func @transform_1(%arg0: i32) -> (i32, i32) {
    %c0_i32 = arith.constant 0 : i32
    %c0_i32_0 = arith.constant 0 : i32
    %c0_i32_1 = arith.constant 0 : i32
    return %c0_i32, %c0_i32_0 : i32, i32
  }
  func.func @transform_2(%arg0: i32) -> (i32, i32) {
    %c0_i32 = arith.constant 0 : i32
    %c0_i32_0 = arith.constant 0 : i32
    %c0_i32_1 = arith.constant 0 : i32
    return %c0_i32, %c0_i32_0 : i32, i32
  }
  func.func @transform_3(%arg0: i32) -> (i32, i32) {
    %c0_i32 = arith.constant 0 : i32
    %c0_i32_0 = arith.constant 0 : i32
    %c0_i32_1 = arith.constant 0 : i32
    return %c0_i32, %c0_i32_0 : i32, i32
  }
  func.func @transform_4(%arg0: i32) -> (i32, i32) {
    %c0_i32 = arith.constant 0 : i32
    %c0_i32_0 = arith.constant 0 : i32
    %c0_i32_1 = arith.constant 0 : i32
    return %c0_i32, %c0_i32_0 : i32, i32
  }
  func.func @transform_5(%arg0: i32) -> (i32, i32) {
    %c0_i32 = arith.constant 0 : i32
    %c0_i32_0 = arith.constant 0 : i32
    %c0_i32_1 = arith.constant 0 : i32
    return %c0_i32, %c0_i32_0 : i32, i32
  }
  func.func @transform_6(%arg0: i32) -> (i32, i32) {
    %c0_i32 = arith.constant 0 : i32
    %c0_i32_0 = arith.constant 0 : i32
    %c0_i32_1 = arith.constant 0 : i32
    return %c0_i32, %c0_i32_0 : i32, i32
  }
  func.func @transform_7(%arg0: i32) -> (i32, i32) {
    %c0_i32 = arith.constant 0 : i32
    %c0_i32_0 = arith.constant 0 : i32
    %c0_i32_1 = arith.constant 0 : i32
    return %c0_i32, %c0_i32_0 : i32, i32
  }
  func.func @transform_8(%arg0: i32) -> (i32, i32) {
    %c0_i32 = arith.constant 0 : i32
    %c0_i32_0 = arith.constant 0 : i32
    %c0_i32_1 = arith.constant 0 : i32
    return %c0_i32, %c0_i32_0 : i32, i32
  }
  func.func @transform_9(%arg0: i32) -> (i32, i32) {
    %c0_i32 = arith.constant 0 : i32
    %c0_i32_0 = arith.constant 0 : i32
    return %arg0, %c0_i32 : i32, i32
  }
  func.func @transform_10(%arg0: i32) -> (i32, i32) {
    %c0_i32 = arith.constant 0 : i32
    %c0_i32_0 = arith.constant 0 : i32
    return %arg0, %c0_i32 : i32, i32
  }
}

</mosaic_0001>

<bundles_post_ra>
// kernel: tpu_custom_call.1
= control target key start
LH: loop header
LB: loop body
LE: loop exit
PB: predicated region body
PF: predicated region fallthrough
CT: control target
= control target key end

     0   :  { %s4516_s0 = inlined_call_operand.hbm [shape: bf16[32,128], index: 0, kind: input, shape index: {}]   ;;  %s4517_s1 = inlined_call_operand.hbm [shape: bf16[128,512], index: 1, kind: input, shape index: {}]   ;;  %s4518_s2 = inlined_call_operand.vmem [shape: f32[1,512], index: 2, kind: input, shape index: {}]   ;;  %s4519_s3 = inlined_call_operand.hbm [shape: bf16[512,384], index: 3, kind: input, shape index: {}]   ;;  %s4520_s4 = inlined_call_operand.vmem [shape: f32[1,384], index: 4, kind: input, shape index: {}]   ;;  %s4521_s5 = inlined_call_operand.hbm [shape: bf16[384,512], index: 5, kind: input, shape index: {}]   ;;  %s4522_s6 = inlined_call_operand.vmem [shape: f32[1,512], index: 6, kind: input, shape index: {}]   ;;  %s4523_s7 = inlined_call_operand.hbm [shape: bf16[512,128], index: 7, kind: input, shape index: {}]   ;;  %s4524_s8 = inlined_call_operand.vmem [shape: f32[1,128], index: 8, kind: input, shape index: {}]   ;;  %s4525_s9 = inlined_call_operand.hbm [shape: bf16[32,384], index: 9, kind: output, shape index: {0}]   ;;  %s4526_s10 = inlined_call_operand.hbm [shape: bf16[32,128], index: 10, kind: output, shape index: {1}]  }
   0x1   :  { %4533 = sst [smem:[#allocation21_spill]] %s4524_s8 }
   0x2   :  { %4534 = sst [smem:[#allocation22_spill]] %s4526_s10 }
   0x3   :  { %16 = vsyncpa [#allocation3], 0 }
   0x4   :  { %18 = vsyncpa [#allocation3 + $0x1], 0 }
   0x5   :  { %19 = vsyncpa [#allocation6], 0 }
   0x6   :  { %20 = vsyncpa [#allocation9], 0 }
   0x7   :  { %21 = vsyncpa [#allocation4], 0 }
   0x8   :  { %23 = vsyncpa [#allocation4 + $0x1], 0 }
   0x9   :  { %24 = vsyncpa [#allocation13], 0 }
   0xa   :  { %26 = vsyncpa [#allocation13 + $0x1], 0  ;;  %s4137_s13 = smov 0   ;;  %s4139_s14 = smov 0  }
   0xb   :  { %s4141_s15 = smov 0   ;;  %s4143_s16 = smov 0  }
   0xc LB: > { %4535 = sst [smem:[#allocation19_spill]] %s4050_s13  ;;  %s4158_s17 = sadd.s32 4294967295, %s4062_s16   ;;  %s4062_s16 = sphi %s4143_s16, %s4561_s16   ;;  %s4058_s15 = sphi %s4141_s15, %s4560_s15   ;;  %s4054_s14 = sphi %s4139_s14, %s4559_s14   ;;  %s4050_s13 = sphi %s4137_s13, %s4558_s13  }
   0xd   : > { %s2942_s18 = sadd.s32 4294967294, %s4062_s16   ;;  %p52_p0 = scmp.ne.s32.totalorder %s4054_s14, %s4050_s13 }
   0xe   : > { %p4527_p1 = scmp.eq.s32.totalorder %s4158_s17, 0  ;;  %p250_p3 = scmp.eq.s32.totalorder %s2942_s18, 1 }
   0xf   : > { %p2943_p5 = scmp.ge.s32.totalorder %s4062_s16, 1  ;;  %p283_p7 = scmp.lt.s32.totalorder %s4062_s16, 3 }
  0x10   : > { %p4167_p4 = por %p4527_p1, %p52_p0  ;;  %p4172_p6 = por %p250_p3, %p52_p0 }
  0x11   : > { %p4177_p8 = pnand %p2943_p5, %p283_p7  ;;  %s4064_s22 = smov [#allocation5]  }
  0x12   : > { %s4536_s19 = scalar_select %p4167_p4, 1, 0 }
  0x13   : > { %s4537_s20 = scalar_select %p4172_p6, 1, 0 }
  0x14   : > { %s4539_s21 = scalar_select %p4177_p8, 1, 0 }
  0x15   : > { %4538 = sst [smem:[#allocation20_spill]] %s4537_s20  ;;  %s295_s23 = sshll.u32 %s4064_s22, 4  ;;  %s4181_s23 = int_to_ptr.vmem [resolvable:$true] %s295_s23 }
  0x16   : > { %p3380_p9 = pneg %p4177_p8  ;;  %s4065_s25 = smov [#allocation8]  }
  0x17   : > { %s327_s26 = sshll.u32 %s4065_s25, 4  ;;  %s4066_s27 = smov [#allocation7]   ;;  %s4192_s26 = int_to_ptr.vmem [resolvable:$true] %s327_s26 }
  0x18   : > { %p4188_p11 = pnand %p3380_p9, %p4527_p1  ;;  %s4194_s28 = sshll.u32 %s4066_s27, 4  ;;  %s312_s28 = int_to_ptr.vmem [resolvable:$true] %s4194_s28 }
  0x19   : > { %s3814_s11 = scalar_lea.hbm %s4517_s1, 4096 }
  0x1a   : > { %p3815_p12 = scmp.ne.s32.totalorder %s4517_s1, %s3814_s11  ;;  %p4204_p13 = pneg %p4188_p11 }
  0x1b   : > { %p3821_p5 = scmp.lt.u32.totalorder %s3814_s11, %s4517_s1 }
  0x1c   : > { %p3817_p0 = pnand %p4204_p13, %p3815_p12 }
  0x1e   : > { %p3818_p3 = pneg %p3817_p0 }
  0x20   : > { %p3823_p7 = pnand %p3821_p5, %p3818_p3 }
  0x22   : > { %3826 = shalt.err (!%p3823_p7)
}
  0x23   : > { %s3827_s29 = scalar_lea.vmem %s4181_s23, 4096  ;;  %p3835_p2 = scmp.lt.s32.totalorder %s4181_s23, %s4181_s23 }
  0x24   : > { %p3828_p9 = scmp.ne.s32.totalorder %s4181_s23, %s3827_s29  ;;  %p3836_p6 = scmp.lt.s32.totalorder %s3827_s29, %s3827_s29 }
  0x26   : > { %p3830_p10 = pnand %p3828_p9, %p4204_p13  ;;  %p3837_p12 = por %p3836_p6, %p3835_p2 }
  0x28   : > { %p3831_p1 = pneg %p3830_p10 }
  0x2a   : > { %p3838_p0 = pnand %p3837_p12, %p3831_p1 }
  0x2c   : > { %3841 = shalt.err (!%p3838_p0)
}
  0x2d   : > { %s4067_s30 = smov 256   ;;  %s4068_s11 = smov 16  }
  0x2e   : > { %3383 = dma.hbm_to_vmem [thread:$0]  (!%p4188_p11), %s4517_s1, 4096, %s4181_s23, [#allocation6], %s4067_s30, %s4067_s30, %s4068_s11  }
  0x2f   : > { %s3842_s20 = scalar_lea.hbm %s4521_s5, 12288 }
  0x30   : > { %p3843_p2 = scmp.ne.s32.totalorder %s4521_s5, %s3842_s20  ;;  %p3849_p10 = scmp.lt.u32.totalorder %s3842_s20, %s4521_s5 }
  0x32   : > { %p3845_p1 = pnand %p3843_p2, %p4204_p13 }
  0x34   : > { %p3846_p6 = pneg %p3845_p1 }
  0x36   : > { %p3851_p3 = pnand %p3849_p10, %p3846_p6 }
  0x38   : > { %3854 = shalt.err (!%p3851_p3)
}
  0x39   : > { %s3855_s23 = scalar_lea.vmem %s4192_s26, 12288  ;;  %p3863_p12 = scmp.lt.s32.totalorder %s4192_s26, %s4192_s26 }
  0x3a   : > { %p3856_p5 = scmp.ne.s32.totalorder %s4192_s26, %s3855_s23  ;;  %p3864_p0 = scmp.lt.s32.totalorder %s3855_s23, %s3855_s23 }
  0x3c   : > { %p3858_p7 = pnand %p3856_p5, %p4204_p13  ;;  %p3865_p2 = por %p3864_p0, %p3863_p12 }
  0x3e   : > { %p3859_p9 = pneg %p3858_p7 }
  0x40   : > { %p3866_p1 = pnand %p3865_p2, %p3859_p9 }
  0x42   : > { %3869 = shalt.err (!%p3866_p1)
}
  0x43   : > { %3389 = dma.hbm_to_vmem [thread:$0]  (!%p4188_p11), %s4521_s5, 12288, %s4192_s26, [#allocation9], %s4067_s30, %s4067_s30, %s4068_s11  }
  0x44   : > { %s3870_s12 = scalar_lea.hbm %s4519_s3, 12288 }
  0x45   : > { %p3871_p6 = scmp.ne.s32.totalorder %s4519_s3, %s3870_s12  ;;  %p3877_p5 = scmp.lt.u32.totalorder %s3870_s12, %s4519_s3 }
  0x47   : > { %p3873_p10 = pnand %p3871_p6, %p4204_p13 }
  0x49   : > { %p3874_p3 = pneg %p3873_p10 }
  0x4b   : > { %p3879_p7 = pnand %p3877_p5, %p3874_p3 }
  0x4d   : > { %3882 = shalt.err (!%p3879_p7)
}
  0x4e   : > { %s3883_s23 = scalar_lea.vmem %s312_s28, 12288  ;;  %p3891_p2 = scmp.lt.s32.totalorder %s312_s28, %s312_s28 }
  0x4f   : > { %p3884_p9 = scmp.ne.s32.totalorder %s312_s28, %s3883_s23  ;;  %p3892_p1 = scmp.lt.s32.totalorder %s3883_s23, %s3883_s23 }
  0x51   : > { %p3886_p12 = pnand %p3884_p9, %p4204_p13  ;;  %p3893_p4 = por %p3892_p1, %p3891_p2 }
  0x53   : > { %p3887_p0 = pneg %p3886_p12 }
  0x55   : > { %p3894_p8 = pnand %p3893_p4, %p3887_p0 }
  0x57   : > { %3897 = shalt.err (!%p3894_p8)
}
  0x58   : > { %s4069_s26 = smov 192   ;;  %s4070_s30 = smov 12  }
  0x59   : > { %3386 = dma.hbm_to_vmem [thread:$0]  (!%p4188_p11), %s4519_s3, 12288, %s312_s28, [#allocation6], %s4069_s26, %s4069_s26, %s4070_s30  }
  0x5a   : > { %s4071_s10 = smov [#allocation10]   ;;  %s3898_s18 = scalar_lea.hbm %s4523_s7, 4096 }
  0x5b   : > { %s343_s13 = sshll.u32 %s4071_s10, 4  ;;  %p3899_p4 = scmp.ne.s32.totalorder %s4523_s7, %s3898_s18  ;;  %s344_s13 = int_to_ptr.vmem [resolvable:$true] %s343_s13 }
  0x5c   : > { %p3905_p10 = scmp.lt.u32.totalorder %s3898_s18, %s4523_s7 }
  0x5d   : > { %p3901_p8 = pnand %p3899_p4, %p4204_p13 }
  0x5f   : > { %p3902_p6 = pneg %p3901_p8 }
  0x61   : > { %p3907_p3 = pnand %p3905_p10, %p3902_p6 }
  0x63   : > { %3910 = shalt.err (!%p3907_p3)
}
  0x64   : > { %s3911_s28 = scalar_lea.vmem %s344_s13, 4096  ;;  %p3919_p12 = scmp.lt.s32.totalorder %s344_s13, %s344_s13 }
  0x65   : > { %p3912_p5 = scmp.ne.s32.totalorder %s344_s13, %s3911_s28  ;;  %p3920_p0 = scmp.lt.s32.totalorder %s3911_s28, %s3911_s28 }
  0x67   : > { %p3914_p7 = pnand %p3912_p5, %p4204_p13  ;;  %p3921_p2 = por %p3920_p0, %p3919_p12 }
  0x69   : > { %p3915_p9 = pneg %p3914_p7 }
  0x6b   : > { %p3922_p1 = pnand %p3921_p2, %p3915_p9 }
  0x6d   : > { %3925 = shalt.err (!%p3922_p1)
}
  0x6e   : > { %s4072_s26 = smov 64   ;;  %s4073_s22 = smov 4  }
  0x6f   : > { %3392 = dma.hbm_to_vmem [thread:$0]  (!%p4188_p11), %s4523_s7, 4096, %s344_s13, [#allocation9], %s4072_s26, %s4072_s26, %s4073_s22  }
  0x70   : > { %s4289_s8 = sadd.s32 1, %s4062_s16   ;;  %s39_s20 = sadd.s32 1, %s4058_s15 }
  0x71   : > { %s36_s10 = ssub.s32 %s4062_s16, %s4289_s8  ;;  %p46_p4 = scmp.ne.s32.totalorder %s4058_s15, %s4054_s14 }
  0x72   : > { %p37_p13 = scmp.eq.s32.totalorder %s36_s10, 0  ;;  %p47_p8 = scmp.eq.s32.totalorder %s4062_s16, 0 }
  0x73   : > { %p4542_p10 = scmp.eq.s32.totalorder %s4158_s17, 1  ;;  %p3408_p5 = scmp.lt.s32.totalorder %s4062_s16, 2 }
  0x74   : > { %s4298_s12 = scalar_select %p37_p13, %s4058_s15, %s39_s20  }
  0x75   : > { %p48_p6 = por %p47_p8, %p46_p4  ;;  %p4302_p3 = por %p4542_p10, %p46_p4 }
  0x76   : > { %s360_s18 = sand.u32 1, %s4058_s15   ;;  %s3231_s13 = sshll.u32 %s4062_s16, 7 }
  0x77   : > { %s2949_s25 = sshll.u32 %s360_s18, 3  ;;  %s4312_s23 = scalar_lea.hbm %s4516_s0, %s3231_s13 }
  0x78   : > { %s364_s28 = scalar_lea.vmem [#allocation2], %s2949_s25  ;;  %p4316_p11 = pnand %p3408_p5, %p48_p6 }
  0x79   : > { %s371_s30 = sshll.u32 %s364_s28, 4  ;;  %s4320_s10 = scalar_lea.sflag [#allocation3], %s360_s18  ;;  %s4314_s30 = int_to_ptr.vmem [resolvable:$true] %s371_s30 }
  0x7a   : > { %s3926_s20 = scalar_lea.hbm %s4312_s23, 128  ;;  %p3928_p9 = pneg %p4316_p11 }
  0x7b   : > { %p3927_p7 = scmp.ne.s32.totalorder %s4312_s23, %s3926_s20  ;;  %s3931_s27 = scalar_lea.hbm %s4516_s0, 256 }
  0x7c   : > { %p3932_p2 = scmp.lt.u32.totalorder %s4312_s23, %s4516_s0  ;;  %p3933_p1 = scmp.lt.u32.totalorder %s3931_s27, %s3926_s20 }
  0x7d   : > { %p3929_p12 = pnand %p3928_p9, %p3927_p7  ;;  %p3935_p4 = scmp.lt.u32.totalorder %s3926_s20, %s4312_s23 }
  0x7e   : > { %p3934_p13 = por %p3933_p1, %p3932_p2 }
  0x7f   : > { %p3930_p0 = pneg %p3929_p12 }
  0x80   : > { %p3936_p8 = por %p3935_p4, %p3934_p13 }
  0x82   : > { %p3937_p6 = pnand %p3936_p8, %p3930_p0 }
  0x84   : > { %3940 = shalt.err (!%p3937_p6)
}
  0x85   : > { %s3941_s18 = scalar_lea.vmem %s4314_s30, 128  ;;  %s4074_s25 = smov [#allocation2]  }
  0x86   : > { %p3942_p10 = scmp.ne.s32.totalorder %s4314_s30, %s3941_s18  ;;  %s3946_s13 = sshll.u32 %s4074_s25, 4  ;;  %s3947_s13 = int_to_ptr.vmem [resolvable:$false] %s3946_s13 }
  0x87   : > { %s3948_s29 = scalar_lea.vmem %s3947_s13, 256  ;;  %p3949_p12 = scmp.lt.s32.totalorder %s4314_s30, %s3947_s13 }
  0x88   : > { %p3944_p5 = pnand %p3942_p10, %p3928_p9  ;;  %p3950_p2 = scmp.lt.s32.totalorder %s3948_s29, %s3941_s18 }
  0x8a   : > { %p3945_p7 = pneg %p3944_p5  ;;  %p3951_p1 = por %p3950_p2, %p3949_p12 }
  0x8c   : > { %p3952_p13 = pnand %p3951_p1, %p3945_p7 }
  0x8e   : > { %3955 = shalt.err (!%p3952_p13)
}
  0x8f   : > { %3396 = dma.hbm_to_vmem [thread:$0]  (!%p4316_p11), %s4312_s23, 128, %s4314_s30, %s4320_s10, %s4072_s26, %s4072_s26, %s4073_s22  }
  0x90   : > { %p4545_p9 = scmp.ne.s32.totalorder %s4539_s21, 0 }
  0x91   : > { %s4354_s20 = sand.u32 (!%p4545_p9), 1, %s4054_s14   ;;  %p4546_p0 = scmp.ne.s32.totalorder (!%p4545_p9), %s4536_s19, 0 }
  0x92   : > { %383 = sbr.rel (%p4545_p9) target bundleno = 1225 (0x4c9), region = 56  ;;  %s2953_s27 = sshll.u32 (!%p4545_p9), %s4354_s20, 3 }
  0x93   : > { %s386_s28 = scalar_lea.sflag (!%p4545_p9), [#allocation3], %s4354_s20  ;;  %s4360_s11 = scalar_lea.vmem (!%p4545_p9), [#allocation2], %s2953_s27 }
  0x99   : > { %4029 = dma.done.wait (%p4546_p0), %s386_s28, 128  }
  0x9a   : > { %4031 = vsyncadd (%p4546_p0), %s386_s28, 4294967168  ;;  %p4547_p11 = scmp.eq.s32.totalorder %s4158_s17, 0 }
  0x9c   : > { %4033 = dma.done.wait (%p4547_p11), [#allocation6], 16384   ;;  %p4548_p4 = pmov %p4547_p11 }
  0x9e   : > { %4035 = vsyncadd (%p4548_p4), [#allocation6], 4294950912  ;;  %p4549_p8 = pmov %p4548_p4 }
  0x9f   : > { %p4550_p6 = pmov %p4548_p4 }
  0xa0   : > { %4037 = dma.done.wait (%p4549_p8), [#allocation9], 16384  }
  0xa1   : > { %4039 = vsyncadd (%p4550_p6), [#allocation9], 4294950912  ;;  %v4075_v0 = vmov 0   ;;  %v3461_v1 = vld [vmem:[#allocation5 + $0x4] ss:$16 sps:$4 sm:$0xff]   ;;  %s3356_s23 = smul.u32 24, %s4354_s20 }
  0xa2   : > { %705 = vmatprep.mubr.bf16.mxu0 %v4075_v0  ;;  %748 = vmatprep.mubr.bf16.mxu1 %v4075_v0  ;;  %v3463_v2 = vld [vmem:[#allocation5] ss:$16 sps:$4 sm:$0xff]   ;;  %v3464_v3 = vld [vmem:[#allocation5 + $0x24] ss:$16 sps:$4 sm:$0xff]   ;;  %v3485_v9 = vld [vmem:[#allocation5 + $0xc] ss:$16 sps:$4 sm:$0xff]  }
  0xa3   : > { %673 = vmatprep.subr.bf16.mxu0 %v3461_v1  ;;  %v3466_v4 = vld [vmem:[#allocation5 + $0x20] ss:$16 sps:$4 sm:$0xff]   ;;  %v3467_v5 = vld [vmem:[#allocation5 + $0x44] ss:$16 sps:$4 sm:$0xff]   ;;  %v3488_v11 = vld [vmem:[#allocation5 + $0x8] ss:$16 sps:$4 sm:$0xff]   ;;  %716 = vmatprep.subr.bf16.mxu1 %v3485_v9 }
  0xa4   : > { %674 = vmatpush1.bf16.msra.mxu0 %v3463_v2  ;;  %v3469_v6 = vld [vmem:[#allocation5 + $0x40] ss:$16 sps:$4 sm:$0xff]   ;;  %v3470_v7 = vld [vmem:[#allocation5 + $0x64] ss:$16 sps:$4 sm:$0xff]   ;;  %v3489_v12 = vld [vmem:[#allocation5 + $0x2c] ss:$16 sps:$4 sm:$0xff]   ;;  %717 = vmatpush1.bf16.msra.mxu1 %v3488_v11 }
  0xa5   : > { %675 = vmatprep.subr.bf16.mxu0 %v3464_v3  ;;  %v3472_v8 = vld [vmem:[#allocation5 + $0x60] ss:$16 sps:$4 sm:$0xff]   ;;  %v3473_v10 = vld [vmem:[#allocation5 + $0x84] ss:$16 sps:$4 sm:$0xff]   ;;  %v3491_v13 = vld [vmem:[#allocation5 + $0x28] ss:$16 sps:$4 sm:$0xff]   ;;  %718 = vmatprep.subr.bf16.mxu1 %v3489_v12 }
  0xa6   : > { %v3475_v14 = vld [vmem:[#allocation5 + $0x80] ss:$16 sps:$4 sm:$0xff]   ;;  %v3492_v15 = vld [vmem:[#allocation5 + $0x4c] ss:$16 sps:$4 sm:$0xff]   ;;  %v3476_v16 = vld [vmem:[#allocation5 + $0xa4] ss:$16 sps:$4 sm:$0xff]  }
  0xa7   : > { %v3494_v17 = vld [vmem:[#allocation5 + $0x48] ss:$16 sps:$4 sm:$0xff]   ;;  %v3478_v18 = vld [vmem:[#allocation5 + $0xa0] ss:$16 sps:$4 sm:$0xff]   ;;  %v3495_v19 = vld [vmem:[#allocation5 + $0x6c] ss:$16 sps:$4 sm:$0xff]  }
  0xa8   : > { %676 = vmatpush1.bf16.msra.mxu0 %v3466_v4  ;;  %719 = vmatpush1.bf16.msra.mxu1 %v3491_v13  ;;  %v3479_v20 = vld [vmem:[#allocation5 + $0xc4] ss:$16 sps:$4 sm:$0xff]   ;;  %v3497_v21 = vld [vmem:[#allocation5 + $0x68] ss:$16 sps:$4 sm:$0xff]   ;;  %v3481_v22 = vld [vmem:[#allocation5 + $0xc0] ss:$16 sps:$4 sm:$0xff]  }
  0xa9   : > { %677 = vmatprep.subr.bf16.mxu0 %v3467_v5  ;;  %720 = vmatprep.subr.bf16.mxu1 %v3492_v15  ;;  %v3498_v23 = vld [vmem:[#allocation5 + $0x8c] ss:$16 sps:$4 sm:$0xff]   ;;  %v3482_v24 = vld [vmem:[#allocation5 + $0xe4] ss:$16 sps:$4 sm:$0xff]   ;;  %v3500_v25 = vld [vmem:[#allocation5 + $0x88] ss:$16 sps:$4 sm:$0xff]  }
  0xaa   : > { %v3484_v26 = vld [vmem:[#allocation5 + $0xe0] ss:$16 sps:$4 sm:$0xff]   ;;  %v3501_v27 = vld [vmem:[#allocation5 + $0xac] ss:$16 sps:$4 sm:$0xff]   ;;  %v3503_v30 = vld [vmem:[#allocation5 + $0xa8] ss:$16 sps:$4 sm:$0xff]  }
  0xab   : > { %v3512_v28 = vld [vmem:[#allocation7 + $0x4] ss:$12 sps:$4 sm:$0xff]   ;;  %v3504_v31 = vld [vmem:[#allocation5 + $0xcc] ss:$16 sps:$4 sm:$0xff]   ;;  %v3506_v34 = vld [vmem:[#allocation5 + $0xc8] ss:$16 sps:$4 sm:$0xff]  }
  0xac   : > { %678 = vmatpush1.bf16.msra.mxu0 %v3469_v6  ;;  %721 = vmatpush1.bf16.msra.mxu1 %v3494_v17  ;;  %v3487_v29 = vld [vmem:[%s4360_s11] sm:$0xff]   ;;  %v3510_v32 = vld [vmem:[#allocation7] ss:$12 sps:$4 sm:$0xff]   ;;  %s4406_s30 = scalar_lea.vmem [#allocation11], %s3356_s23  ;;  %s3357_s13 = smul.u32 384, %s4158_s17 }
  0xad   : > { %679 = vmatprep.subr.bf16.mxu0 %v3470_v7  ;;  %722 = vmatprep.subr.bf16.mxu1 %v3495_v19  ;;  %v3515_v33 = vld [vmem:[#allocation7 + $0x1c] ss:$12 sps:$4 sm:$0xff]   ;;  %v3513_v36 = vld [vmem:[#allocation7 + $0x18] ss:$12 sps:$4 sm:$0xff]   ;;  %v3518_v37 = vld [vmem:[#allocation7 + $0x34] ss:$12 sps:$4 sm:$0xff]  }
  0xae   : > { %v3507_v35 = vld [vmem:[#allocation5 + $0xec] ss:$16 sps:$4 sm:$0xff]   ;;  %v3509_v38 = vld [vmem:[#allocation5 + $0xe8] ss:$16 sps:$4 sm:$0xff]   ;;  %v3524_v45 = vld [vmem:[#allocation7 + $0x64] ss:$12 sps:$4 sm:$0xff]   ;;  %s4435_s11 = scalar_lea.hbm %s4525_s9, %s3357_s13 }
  0xaf   : > { %v3516_v39 = vld [vmem:[#allocation7 + $0x30] ss:$12 sps:$4 sm:$0xff]   ;;  %v3537_v40 = vld [vmem:[#allocation7 + $0xc8] ss:$12 sps:$4 sm:$0xff]   ;;  %v3521_v41 = vld [vmem:[#allocation7 + $0x4c] ss:$12 sps:$4 sm:$0xff]  }
  0xb0   : > { %680 = vmatpush1.bf16.msra.mxu0 %v3472_v8  ;;  %723 = vmatpush1.bf16.msra.mxu1 %v3497_v21  ;;  %v3519_v42 = vld [vmem:[#allocation7 + $0x48] ss:$12 sps:$4 sm:$0xff]   ;;  %v3542_v44 = vld [vmem:[#allocation7 + $0xe0] ss:$12 sps:$4 sm:$0xff]   ;;  %v3547_v48 = vld [vmem:[#allocation7 + $0xf8] ss:$12 sps:$4 sm:$0xff]   ;;  %v487_v21 = vlaneseq }
  0xb1   : > { %681 = vmatprep.subr.bf16.mxu0 %v3473_v10  ;;  %724 = vmatprep.subr.bf16.mxu1 %v3498_v23  ;;  %v3538_v43 = vld [vmem:[#allocation7 + $0x8] ss:$12 sps:$4 sm:$0xff]   ;;  %v3543_v46 = vld [vmem:[#allocation7 + $0x20] ss:$12 sps:$4 sm:$0xff]   ;;  %v3525_v50 = vld [vmem:[#allocation7 + $0x78] ss:$12 sps:$4 sm:$0xff]  }
  0xb2   : > { %v3522_v47 = vld [vmem:[#allocation7 + $0x60] ss:$12 sps:$4 sm:$0xff]   ;;  %v3527_v49 = vld [vmem:[#allocation7 + $0x7c] ss:$12 sps:$4 sm:$0xff]   ;;  %v3548_v52 = vld [vmem:[#allocation7 + $0x38] ss:$12 sps:$4 sm:$0xff]  }
  0xb3   : > { %v3530_v51 = vld [vmem:[#allocation7 + $0x94] ss:$12 sps:$4 sm:$0xff]   ;;  %v3552_v53 = vld [vmem:[#allocation7 + $0x110] ss:$12 sps:$4 sm:$0xff]   ;;  %v3533_v57 = vld [vmem:[#allocation7 + $0xac] ss:$12 sps:$4 sm:$0xff]  }
  0xb4   : > { %682 = vmatpush1.bf16.msra.mxu0 %v3475_v14  ;;  %725 = vmatpush1.bf16.msra.mxu1 %v3500_v25  ;;  %v3553_v54 = vld [vmem:[#allocation7 + $0x50] ss:$12 sps:$4 sm:$0xff]   ;;  %v3557_v56 = vld [vmem:[#allocation7 + $0x128] ss:$12 sps:$4 sm:$0xff]   ;;  %v3562_v60 = vld [vmem:[#allocation7 + $0x140] ss:$12 sps:$4 sm:$0xff]  }
  0xb5   : > { %683 = vmatprep.subr.bf16.mxu0 %v3476_v16  ;;  %726 = vmatprep.subr.bf16.mxu1 %v3501_v27  ;;  %v3528_v55 = vld [vmem:[#allocation7 + $0x90] ss:$12 sps:$4 sm:$0xff]   ;;  %v3558_v58 = vld [vmem:[#allocation7 + $0x68] ss:$12 sps:$4 sm:$0xff]   ;;  %v3563_v62 = vld [vmem:[#allocation7 + $0x80] ss:$12 sps:$4 sm:$0xff]  }
  0xb6   : > { %v3531_v59 = vld [vmem:[#allocation7 + $0xa8] ss:$12 sps:$4 sm:$0xff]   ;;  %v3536_v61 = vld [vmem:[#allocation7 + $0xc4] ss:$12 sps:$4 sm:$0xff]   ;;  %v3534_v63 = vld [vmem:[#allocation7 + $0xc0] ss:$12 sps:$4 sm:$0xff]  }
  0xb7   : > { %v3541_v1 = vld [vmem:[#allocation7 + $0xdc] ss:$12 sps:$4 sm:$0xff]   ;;  %v3539_v2 = vld [vmem:[#allocation7 + $0xd8] ss:$12 sps:$4 sm:$0xff]   ;;  %v3546_v3 = vld [vmem:[#allocation7 + $0xf4] ss:$12 sps:$4 sm:$0xff]  }
  0xb8   : > { %684 = vmatpush1.bf16.msra.mxu0 %v3478_v18  ;;  %727 = vmatpush1.bf16.msra.mxu1 %v3503_v30  ;;  %v3544_v4 = vld [vmem:[#allocation7 + $0xf0] ss:$12 sps:$4 sm:$0xff]   ;;  %v3551_v5 = vld [vmem:[#allocation7 + $0x10c] ss:$12 sps:$4 sm:$0xff]   ;;  %v3549_v6 = vld [vmem:[#allocation7 + $0x108] ss:$12 sps:$4 sm:$0xff]  }
  0xb9   : > { %685 = vmatprep.subr.bf16.mxu0 %v3479_v20  ;;  %728 = vmatprep.subr.bf16.mxu1 %v3504_v31  ;;  %v3556_v7 = vld [vmem:[#allocation7 + $0x124] ss:$12 sps:$4 sm:$0xff]   ;;  %v3554_v8 = vld [vmem:[#allocation7 + $0x120] ss:$12 sps:$4 sm:$0xff]   ;;  %v3561_v9 = vld [vmem:[#allocation7 + $0x13c] ss:$12 sps:$4 sm:$0xff]  }
  0xba   : > { %v3559_v10 = vld [vmem:[#allocation7 + $0x138] ss:$12 sps:$4 sm:$0xff]   ;;  %v3566_v11 = vld [vmem:[#allocation7 + $0x154] ss:$12 sps:$4 sm:$0xff]   ;;  %v3564_v13 = vld [vmem:[#allocation7 + $0x150] ss:$12 sps:$4 sm:$0xff]  }
  0xbb   : > { %v3567_v12 = vld [vmem:[#allocation7 + $0x158] ss:$12 sps:$4 sm:$0xff]   ;;  %v3572_v16 = vld [vmem:[#allocation7 + $0x170] ss:$12 sps:$4 sm:$0xff]   ;;  %v3569_v17 = vld [vmem:[#allocation7 + $0x168] ss:$12 sps:$4 sm:$0xff]  }
  0xbc   : > { %686 = vmatpush1.bf16.msra.mxu0 %v3481_v22  ;;  %729 = vmatpush1.bf16.msra.mxu1 %v3506_v34  ;;  %v3568_v14 = vld [vmem:[#allocation7 + $0x98] ss:$12 sps:$4 sm:$0xff]   ;;  %v3573_v18 = vld [vmem:[#allocation7 + $0xb0] ss:$12 sps:$4 sm:$0xff]   ;;  %v3577_v20 = vld [vmem:[#allocation7 + $0x248] ss:$12 sps:$4 sm:$0xff]  }
  0xbd   : > { %687 = vmatprep.subr.bf16.mxu0 %v3482_v24  ;;  %730 = vmatprep.subr.bf16.mxu1 %v3507_v35  ;;  %v3571_v15 = vld [vmem:[#allocation7 + $0x16c] ss:$12 sps:$4 sm:$0xff]   ;;  %v3576_v19 = vld [vmem:[#allocation7 + $0x184] ss:$12 sps:$4 sm:$0xff]   ;;  %v4377_v22 = vshrl.u32 %v487_v21, 7  ;;  %s2783_s25 = sshll.u32 %s4406_s30, 4  ;;  %s4430_s25 = int_to_ptr.vmem [resolvable:$true] %s2783_s25 }
  0xbe   : > { %v485_v24 = vld [vmem:[%s4518_s2] sm:$0xf]  ;;  %s2764_s19 = scalar_lea.sflag [#allocation4], %s4354_s20  ;;  %s3956_s21 = scalar_lea.vmem %s4430_s25, 384 }
  0xbf   : > { %v4380_v23 = vsub.s32 0, %v4377_v22  ;;  %v4386_v25 = vsub.s32 1, %v4377_v22  ;;  %v3604_v21 = vld [vmem:[#allocation7 + $0x210] ss:$12 sps:$4 sm:$0xff]   ;;  %p3957_p10 = scmp.ne.s32.totalorder %s4430_s25, %s3956_s21  ;;  %s4076_s26 = smov [#allocation11]  }
  0xc0   : > { %688 = vmatpush1.bf16.msra.mxu0 %v3484_v26  ;;  %731 = vmatpush1.bf16.msra.mxu1 %v3509_v38  ;;  %s3960_s22 = sshll.u32 %s4076_s26, 4  ;;  %s3961_s22 = int_to_ptr.vmem [resolvable:$false] %s3960_s22 }
  0xc1   : > { %1428 = vmatprep.subr.bf16.mxu0 %v3512_v28  ;;  %3244 = vmatprep.subr.bf16.mxu1 %v3537_v40  ;;  %v490_v26 = vrot.slane %v485_v24, %v4380_v23  ;;  %v494_v27 = vrot.slane %v485_v24, %v4386_v25  ;;  %p3958_p5 = pnand %p3957_p10, %p4302_p3  ;;  %s3962_s23 = scalar_lea.vmem %s3961_s22, 768 }
  0xc2   : > { %p3963_p12 = scmp.lt.s32.totalorder %s4430_s25, %s3961_s22  ;;  %p3964_p2 = scmp.lt.s32.totalorder %s3962_s23, %s3956_s21 }
  0xc3   : > { %706 = vmatmul.mubr.bf16.vlgmr.msra.gmra.mrb[0].mxu0 %v3487_v29  ;;  %749 = vmatmul.mubr.bf16.vlgmr.msra.gmra.mrb[0].mxu1 %v3487_v29  ;;  %p3959_p7 = pneg %p3958_p5 }
  0xc4   : > { %1429 = vmatpush1.bf16.msra.mxu0 %v3510_v32  ;;  %3245 = vmatpush3.bf16.msra.mxu1 %v3538_v43  ;;  %p3965_p1 = por %p3964_p2, %p3963_p12 }
  0xc5   : > { %1430 = vmatprep.subr.bf16.mxu0 %v3515_v33  ;;  %3246 = vmatprep.subr.bf16.mxu1 %v3542_v44  ;;  %v3574_v44 = vld [vmem:[#allocation7 + $0x180] ss:$12 sps:$4 sm:$0xff]  }
  0xc6   : > { %p3966_p13 = pnand %p3965_p1, %p3959_p7 }
  0xc8   : > { %1431 = vmatpush1.bf16.msra.mxu0 %v3513_v36  ;;  %3247 = vmatpush3.bf16.msra.mxu1 %v3543_v46  ;;  %v4391_v36 = vsub.s32 2, %v4377_v22 }
  0xc9   : > { %1432 = vmatprep.subr.bf16.mxu0 %v3518_v37  ;;  %3248 = vmatprep.subr.bf16.mxu1 %v3547_v48  ;;  %v3582_v48 = vld [vmem:[#allocation7 + $0x260] ss:$12 sps:$4 sm:$0xff]  }
  0xca   : > { %v498_v46 = vrot.slane %v485_v24, %v4391_v36 }
  0xcc   : > { %1433 = vmatpush1.bf16.msra.mxu0 %v3516_v39  ;;  %3249 = vmatpush3.bf16.msra.mxu1 %v3548_v52  ;;  %v501_v39 = vsub.s32 3, %v4377_v22  ;;  %v3583_v52 = vld [vmem:[#allocation7 + $0x1a0] ss:$12 sps:$4 sm:$0xff]  }
  0xcd   : > { %1434 = vmatprep.subr.bf16.mxu0 %v3521_v41  ;;  %3250 = vmatprep.subr.bf16.mxu1 %v3552_v53 }
  0xd0   : > { %1435 = vmatpush1.bf16.msra.mxu0 %v3519_v42  ;;  %3251 = vmatpush3.bf16.msra.mxu1 %v3553_v54 }
  0xd1   : > { %1436 = vmatprep.subr.bf16.mxu0 %v3524_v45  ;;  %3252 = vmatprep.subr.bf16.mxu1 %v3557_v56  ;;  %v3578_v45 = vld [vmem:[#allocation7 + $0x188] ss:$12 sps:$4 sm:$0xff]   ;;  %v3587_v56 = vld [vmem:[#allocation7 + $0x278] ss:$12 sps:$4 sm:$0xff]  }
  0xd4   : > { %1437 = vmatpush1.bf16.msra.mxu0 %v3522_v47  ;;  %3253 = vmatpush3.bf16.msra.mxu1 %v3558_v58  ;;  %v3581_v47 = vld [vmem:[#allocation7 + $0x19c] ss:$12 sps:$4 sm:$0xff]  }
  0xd5   : > { %1438 = vmatprep.subr.bf16.mxu0 %v3527_v49  ;;  %3254 = vmatprep.subr.bf16.mxu1 %v3562_v60  ;;  %v502_v49 = vrot.slane %v485_v24, %v501_v39  ;;  %v3608_v24 = vld [vmem:[#allocation7 + $0x218] ss:$12 sps:$4 sm:$0xff]  }
  0xd8   : > { %1439 = vmatpush1.bf16.msra.mxu0 %v3525_v50  ;;  %3255 = vmatpush3.bf16.msra.mxu1 %v3563_v62 }
  0xd9   : > { %1440 = vmatprep.subr.bf16.mxu0 %v3530_v51  ;;  %3256 = vmatprep.subr.bf16.mxu1 %v3567_v12  ;;  %v3579_v51 = vld [vmem:[#allocation7 + $0x198] ss:$12 sps:$4 sm:$0xff]   ;;  %v3597_v12 = vld [vmem:[#allocation7 + $0x2a8] ss:$12 sps:$4 sm:$0xff]  }
  0xdc   : > { %1441 = vmatpush1.bf16.msra.mxu0 %v3528_v55  ;;  %3257 = vmatpush3.bf16.msra.mxu1 %v3568_v14  ;;  %v3586_v55 = vld [vmem:[#allocation7 + $0x1b4] ss:$12 sps:$4 sm:$0xff]  }
  0xdd   : > { %1442 = vmatprep.subr.bf16.mxu0 %v3533_v57  ;;  %3258 = vmatprep.subr.bf16.mxu1 %v3572_v16  ;;  %v3598_v14 = vld [vmem:[#allocation7 + $0x1e8] ss:$12 sps:$4 sm:$0xff]   ;;  %v3602_v16 = vld [vmem:[#allocation7 + $0x2c0] ss:$12 sps:$4 sm:$0xff]  }
  0xe0   : > { %1443 = vmatpush1.bf16.msra.mxu0 %v3531_v59  ;;  %3259 = vmatpush3.bf16.msra.mxu1 %v3573_v18  ;;  %v3603_v18 = vld [vmem:[#allocation7 + $0x200] ss:$12 sps:$4 sm:$0xff]  }
  0xe1   : > { %1444 = vmatprep.subr.bf16.mxu0 %v3536_v61  ;;  %3266 = vmatprep.subr.bf16.mxu1 %v3577_v20  ;;  %v3607_v20 = vld [vmem:[#allocation7 + $0x2d8] ss:$12 sps:$4 sm:$0xff]  }
  0xe4   : > { %1445 = vmatpush1.bf16.msra.mxu0 %v3534_v63 }
  0xe5   : > { %1446 = vmatprep.subr.bf16.mxu0 %v3541_v1  ;;  %v3584_v1 = vld [vmem:[#allocation7 + $0x1b0] ss:$12 sps:$4 sm:$0xff]  }
  0xe8   : > { %1447 = vmatpush1.bf16.msra.mxu0 %v3539_v2  ;;  %v3588_v2 = vld [vmem:[#allocation7 + $0x1b8] ss:$12 sps:$4 sm:$0xff]  }
  0xe9   : > { %1448 = vmatprep.subr.bf16.mxu0 %v3546_v3 }
  0xec   : > { %1449 = vmatpush1.bf16.msra.mxu0 %v3544_v4  ;;  %v3591_v4 = vld [vmem:[#allocation7 + $0x1cc] ss:$12 sps:$4 sm:$0xff]  }
  0xed   : > { %1450 = vmatprep.subr.bf16.mxu0 %v3551_v5  ;;  %v3592_v5 = vld [vmem:[#allocation7 + $0x290] ss:$12 sps:$4 sm:$0xff]  }
  0xf0   : > { %1451 = vmatpush1.bf16.msra.mxu0 %v3549_v6 }
  0xf1   : > { %1452 = vmatprep.subr.bf16.mxu0 %v3556_v7 }
  0xf4   : > { %1453 = vmatpush1.bf16.msra.mxu0 %v3554_v8 }
  0xf5   : > { %1454 = vmatprep.subr.bf16.mxu0 %v3561_v9  ;;  %v3589_v9 = vld [vmem:[#allocation7 + $0x1c8] ss:$12 sps:$4 sm:$0xff]  }
  0xf8   : > { %1455 = vmatpush1.bf16.msra.mxu0 %v3559_v10  ;;  %v3593_v10 = vld [vmem:[#allocation7 + $0x1d0] ss:$12 sps:$4 sm:$0xff]  }
  0xf9   : > { %1456 = vmatprep.subr.bf16.mxu0 %v3566_v11  ;;  %v3596_v11 = vld [vmem:[#allocation7 + $0x1e4] ss:$12 sps:$4 sm:$0xff]  }
  0xfc   : > { %1457 = vmatpush1.bf16.msra.mxu0 %v3564_v13  ;;  %v3594_v13 = vld [vmem:[#allocation7 + $0x1e0] ss:$12 sps:$4 sm:$0xff]  }
  0xfd   : > { %1458 = vmatprep.subr.bf16.mxu0 %v3571_v15  ;;  %v3601_v15 = vld [vmem:[#allocation7 + $0x1fc] ss:$12 sps:$4 sm:$0xff]  }
 0x100   : > { %1459 = vmatpush1.bf16.msra.mxu0 %v3569_v17  ;;  %v3599_v17 = vld [vmem:[#allocation7 + $0x1f8] ss:$12 sps:$4 sm:$0xff]  }
 0x101   : > { %1471 = vmatprep.subr.bf16.mxu0 %v3576_v19  ;;  %v3606_v19 = vld [vmem:[#allocation7 + $0x214] ss:$12 sps:$4 sm:$0xff]  }
 0x196   : > { %v707_v28 = vpop.f32.mrb[0].mxu0  ;;  %v750_v50 = vpop.f32.mrb[0].mxu1 }
 0x197   : > { %v708_v29 = vadd.f32 %v707_v28, %v490_v26  ;;  %v709_v30 = vpop.f32.mrb[1].mxu0  ;;  %v751_v53 = vadd.f32 %v750_v50, %v498_v46  ;;  %v752_v54 = vpop.f32.mrb[1].mxu1  ;;  %v3609_v28 = vld [vmem:[#allocation7 + $0x228] ss:$12 sps:$4 sm:$0xff]  }
 0x198   : > { %v710_v31 = vadd.f32 %v709_v30, %v494_v27  ;;  %v711_v32 = vpop.f32.mrb[2].mxu0  ;;  %v753_v57 = vadd.f32 %v752_v54, %v502_v49  ;;  %v754_v58 = vpop.f32.mrb[2].mxu1  ;;  %v3616_v30 = vld [vmem:[#allocation7 + $0x244] ss:$12 sps:$4 sm:$0xff]   ;;  %v3641_v50 = vld [vmem:[#allocation8 + $0x8] ss:$16 sps:$4 sm:$0xff]  }
 0x199   : > { %v712_v33 = vadd.f32 %v711_v32, %v490_v26  ;;  %v713_v34 = vpop.f32.mrb[3].mxu0  ;;  %v759_v37 = vmax.f32 %v708_v29, 0.0  ;;  %v761_v59 = vmax.f32 %v751_v53, 0.0  ;;  %v755_v60 = vadd.f32 %v754_v58, %v498_v46  ;;  %v756_v61 = vpop.f32.mrb[3].mxu1  ;;  %v3611_v26 = vld [vmem:[#allocation7 + $0x22c] ss:$12 sps:$4 sm:$0xff]  }
 0x19a   : > { %v714_v35 = vadd.f32 %v713_v34, %v494_v27  ;;  %v760_v40 = vmax.f32 %v710_v31, 0.0  ;;  %v762_v62 = vmax.f32 %v753_v57, 0.0  ;;  %v757_v63 = vadd.f32 %v756_v61, %v502_v49  ;;  %v3612_v27 = vld [vmem:[#allocation7 + $0x2f0] ss:$12 sps:$4 sm:$0xff]   ;;  %v3614_v31 = vld [vmem:[#allocation7 + $0x240] ss:$12 sps:$4 sm:$0xff]  }
 0x19b   : > { %v763_v38 = vmax.f32 %v712_v33, 0.0  ;;  %v765_v3 = vmax.f32 %v755_v60, 0.0  ;;  %v3613_v29 = vld [vmem:[#allocation7 + $0x230] ss:$12 sps:$4 sm:$0xff]   ;;  %v3617_v33 = vld [vmem:[#allocation7 + $0x258] ss:$12 sps:$4 sm:$0xff]  }
 0x19c   : > { %v764_v41 = vmax.f32 %v714_v35, 0.0  ;;  %v766_v6 = vmax.f32 %v757_v63, 0.0  ;;  %v3619_v32 = vld [vmem:[#allocation7 + $0x25c] ss:$12 sps:$4 sm:$0xff]   ;;  %v3622_v34 = vld [vmem:[#allocation7 + $0x274] ss:$12 sps:$4 sm:$0xff]  }
 0x19d   : > { %v767_v42 = vpack.c.bf16 %v763_v38, %v759_v37  ;;  %v4397_v7 = vpack.c.bf16 %v765_v3, %v761_v59  ;;  %v3620_v35 = vld [vmem:[#allocation7 + $0x270] ss:$12 sps:$4 sm:$0xff]   ;;  %v3625_v37 = vld [vmem:[#allocation7 + $0x28c] ss:$12 sps:$4 sm:$0xff]   ;;  %v3623_v38 = vld [vmem:[#allocation7 + $0x288] ss:$12 sps:$4 sm:$0xff]  }
 0x19e   : > { %v768_v43 = vpack.c.bf16 %v764_v41, %v760_v40  ;;  %v770_v8 = vpack.c.bf16 %v766_v6, %v762_v62  ;;  %v3628_v40 = vld [vmem:[#allocation7 + $0x2a4] ss:$12 sps:$4 sm:$0xff]   ;;  %v3626_v41 = vld [vmem:[#allocation7 + $0x2a0] ss:$12 sps:$4 sm:$0xff]   ;;  %v3653_v59 = vld [vmem:[#allocation8 + $0x48] ss:$16 sps:$4 sm:$0xff]  }
 0x19f   : > { %v3637_v46 = vld [vmem:[#allocation7 + $0x2ec] ss:$12 sps:$4 sm:$0xff]   ;;  %v3640_v49 = vld [vmem:[#allocation8 + $0x4] ss:$16 sps:$4 sm:$0xff]   ;;  %v3644_v54 = vld [vmem:[#allocation8 + $0x20] ss:$16 sps:$4 sm:$0xff]  }
 0x1a0   : > { %1460 = vmatprep.mubr.bf16.mxu0 %v768_v43  ;;  %1546 = vmatprep.mubr.bf16.mxu1 %v768_v43  ;;  %v3629_v43 = vld [vmem:[#allocation7 + $0x2b8] ss:$12 sps:$4 sm:$0xff]   ;;  %v3649_v53 = vld [vmem:[#allocation8 + $0x2c] ss:$16 sps:$4 sm:$0xff]   ;;  %v3650_v58 = vld [vmem:[#allocation8 + $0x40] ss:$16 sps:$4 sm:$0xff]  }
 0x1a1   : > { %1461 = vmatmul.mubr.bf16.vlgmr.msra.gmra.mrb[4].mxu0 %v767_v42  ;;  %1547 = vmatmul.mubr.bf16.vlgmr.msra.gmra.mrb[4].mxu1 %v767_v42  ;;  %v3631_v42 = vld [vmem:[#allocation7 + $0x2bc] ss:$12 sps:$4 sm:$0xff]   ;;  %v3658_v60 = vld [vmem:[#allocation8 + $0x64] ss:$16 sps:$4 sm:$0xff]   ;;  %v3656_v62 = vld [vmem:[#allocation8 + $0x60] ss:$16 sps:$4 sm:$0xff]  }
 0x1a2   : > { %1472 = vmatpush1.bf16.msra.mxu0 %v3574_v44  ;;  %3267 = vmatpush3.bf16.msra.mxu1 %v3578_v45  ;;  %v3634_v44 = vld [vmem:[#allocation7 + $0x2d4] ss:$12 sps:$4 sm:$0xff]   ;;  %v3632_v45 = vld [vmem:[#allocation7 + $0x2d0] ss:$12 sps:$4 sm:$0xff]   ;;  %v3659_v63 = vld [vmem:[#allocation8 + $0x68] ss:$16 sps:$4 sm:$0xff]  }
 0x1a3   : > { %1473 = vmatprep.subr.bf16.mxu0 %v3581_v47  ;;  %3268 = vmatprep.subr.bf16.mxu1 %v3582_v48  ;;  %v3635_v47 = vld [vmem:[#allocation7 + $0x2e8] ss:$12 sps:$4 sm:$0xff]   ;;  %v3638_v48 = vld [vmem:[#allocation8] ss:$16 sps:$4 sm:$0xff]   ;;  %v3655_v57 = vld [vmem:[#allocation8 + $0x4c] ss:$16 sps:$4 sm:$0xff]  }
 0x1a4   : > { %1587 = vmatprep.mubr.bf16.mxu1 %v770_v8  ;;  %1503 = vmatprep.mubr.bf16.mxu0 %v770_v8  ;;  %v3661_v61 = vld [vmem:[#allocation8 + $0x6c] ss:$16 sps:$4 sm:$0xff]   ;;  %v3662_v3 = vld [vmem:[#allocation8 + $0x80] ss:$16 sps:$4 sm:$0xff]   ;;  %v3671_v8 = vld [vmem:[#allocation8 + $0xa8] ss:$16 sps:$4 sm:$0xff]  }
 0x1a5   : > { %v3673_v6 = vld [vmem:[#allocation8 + $0xac] ss:$16 sps:$4 sm:$0xff]  }
 0x1a6   : > { %1474 = vmatpush1.bf16.msra.mxu0 %v3579_v51  ;;  %3269 = vmatpush3.bf16.msra.mxu1 %v3583_v52  ;;  %v3643_v51 = vld [vmem:[#allocation8 + $0xc] ss:$16 sps:$4 sm:$0xff]   ;;  %v3646_v52 = vld [vmem:[#allocation8 + $0x24] ss:$16 sps:$4 sm:$0xff]  }
 0x1a7   : > { %1475 = vmatprep.subr.bf16.mxu0 %v3586_v55  ;;  %3270 = vmatprep.subr.bf16.mxu1 %v3587_v56  ;;  %v3647_v55 = vld [vmem:[#allocation8 + $0x28] ss:$16 sps:$4 sm:$0xff]   ;;  %v3652_v56 = vld [vmem:[#allocation8 + $0x44] ss:$16 sps:$4 sm:$0xff]  }
 0x1aa   : > { %1476 = vmatpush1.bf16.msra.mxu0 %v3584_v1  ;;  %3271 = vmatpush3.bf16.msra.mxu1 %v3588_v2  ;;  %v3664_v1 = vld [vmem:[#allocation8 + $0x84] ss:$16 sps:$4 sm:$0xff]   ;;  %v3667_v2 = vld [vmem:[#allocation8 + $0x8c] ss:$16 sps:$4 sm:$0xff]  }
 0x1ab   : > { %1477 = vmatprep.subr.bf16.mxu0 %v3591_v4  ;;  %3272 = vmatprep.subr.bf16.mxu1 %v3592_v5  ;;  %v3665_v4 = vld [vmem:[#allocation8 + $0x88] ss:$16 sps:$4 sm:$0xff]   ;;  %v3670_v5 = vld [vmem:[#allocation8 + $0xa4] ss:$16 sps:$4 sm:$0xff]  }
 0x1ae   : > { %1478 = vmatpush1.bf16.msra.mxu0 %v3589_v9  ;;  %3273 = vmatpush3.bf16.msra.mxu1 %v3593_v10  ;;  %v3676_v9 = vld [vmem:[#allocation8 + $0xc4] ss:$16 sps:$4 sm:$0xff]   ;;  %v3679_v10 = vld [vmem:[#allocation8 + $0xcc] ss:$16 sps:$4 sm:$0xff]  }
 0x1af   : > { %1479 = vmatprep.subr.bf16.mxu0 %v3596_v11  ;;  %3274 = vmatprep.subr.bf16.mxu1 %v3597_v12  ;;  %v3674_v11 = vld [vmem:[#allocation8 + $0xc0] ss:$16 sps:$4 sm:$0xff]   ;;  %v3677_v12 = vld [vmem:[#allocation8 + $0xc8] ss:$16 sps:$4 sm:$0xff]  }
 0x1b2   : > { %1480 = vmatpush1.bf16.msra.mxu0 %v3594_v13  ;;  %3275 = vmatpush3.bf16.msra.mxu1 %v3598_v14  ;;  %v3682_v13 = vld [vmem:[#allocation8 + $0xe4] ss:$16 sps:$4 sm:$0xff]   ;;  %v3685_v14 = vld [vmem:[#allocation8 + $0xec] ss:$16 sps:$4 sm:$0xff]  }
 0x1b3   : > { %1481 = vmatprep.subr.bf16.mxu0 %v3601_v15  ;;  %3276 = vmatprep.subr.bf16.mxu1 %v3602_v16  ;;  %v3680_v15 = vld [vmem:[#allocation8 + $0xe0] ss:$16 sps:$4 sm:$0xff]   ;;  %v3683_v16 = vld [vmem:[#allocation8 + $0xe8] ss:$16 sps:$4 sm:$0xff]  }
 0x1b6   : > { %1482 = vmatpush1.bf16.msra.mxu0 %v3599_v17  ;;  %3277 = vmatpush3.bf16.msra.mxu1 %v3603_v18  ;;  %v3688_v17 = vld [vmem:[#allocation8 + $0x104] ss:$16 sps:$4 sm:$0xff]   ;;  %v3691_v18 = vld [vmem:[#allocation8 + $0x10c] ss:$16 sps:$4 sm:$0xff]  }
 0x1b7   : > { %1483 = vmatprep.subr.bf16.mxu0 %v3606_v19  ;;  %3278 = vmatprep.subr.bf16.mxu1 %v3607_v20  ;;  %v3686_v19 = vld [vmem:[#allocation8 + $0x100] ss:$16 sps:$4 sm:$0xff]   ;;  %v3689_v20 = vld [vmem:[#allocation8 + $0x108] ss:$16 sps:$4 sm:$0xff]  }
 0x1ba   : > { %1484 = vmatpush1.bf16.msra.mxu0 %v3604_v21  ;;  %3279 = vmatpush3.bf16.msra.mxu1 %v3608_v24  ;;  %v3692_v21 = vld [vmem:[#allocation8 + $0x120] ss:$16 sps:$4 sm:$0xff]   ;;  %v3694_v24 = vld [vmem:[#allocation8 + $0x124] ss:$16 sps:$4 sm:$0xff]  }
 0x1bb   : > { %1485 = vmatprep.subr.bf16.mxu0 %v3611_v26  ;;  %3280 = vmatprep.subr.bf16.mxu1 %v3612_v27  ;;  %v3695_v26 = vld [vmem:[#allocation8 + $0x128] ss:$16 sps:$4 sm:$0xff]   ;;  %v3697_v27 = vld [vmem:[#allocation8 + $0x12c] ss:$16 sps:$4 sm:$0xff]  }
 0x1be   : > { %1486 = vmatpush1.bf16.msra.mxu0 %v3609_v28  ;;  %3281 = vmatpush3.bf16.msra.mxu1 %v3613_v29  ;;  %v3700_v28 = vld [vmem:[#allocation8 + $0x144] ss:$16 sps:$4 sm:$0xff]   ;;  %v3703_v29 = vld [vmem:[#allocation8 + $0x14c] ss:$16 sps:$4 sm:$0xff]  }
 0x1bf   : > { %1487 = vmatprep.subr.bf16.mxu0 %v3616_v30  ;;  %2224 = vmatprep.subr.bf16.mxu1 %v3640_v49  ;;  %v3698_v30 = vld [vmem:[#allocation8 + $0x140] ss:$16 sps:$4 sm:$0xff]   ;;  %v3725_v49 = vld [vmem:[#allocation8 + $0x1c8] ss:$16 sps:$4 sm:$0xff]  }
 0x1c1   : > { %1588 = vmatmul.mubr.bf16.vlgmr.msra.gmra.mrb[8].mxu1 %v4397_v7 }
 0x1c2   : > { %1488 = vmatpush1.bf16.msra.mxu0 %v3614_v31  ;;  %2225 = vmatpush1.bf16.msra.mxu1 %v3638_v48  ;;  %v3701_v31 = vld [vmem:[#allocation8 + $0x148] ss:$16 sps:$4 sm:$0xff]   ;;  %v3722_v48 = vld [vmem:[#allocation8 + $0x1c0] ss:$16 sps:$4 sm:$0xff]  }
 0x1c3   : > { %1489 = vmatprep.subr.bf16.mxu0 %v3619_v32  ;;  %2226 = vmatprep.subr.bf16.mxu1 %v3646_v52  ;;  %v3706_v32 = vld [vmem:[#allocation8 + $0x164] ss:$16 sps:$4 sm:$0xff]   ;;  %v3728_v52 = vld [vmem:[#allocation8 + $0x1e0] ss:$16 sps:$4 sm:$0xff]  }
 0x1c6   : > { %1490 = vmatpush1.bf16.msra.mxu0 %v3617_v33  ;;  %2227 = vmatpush1.bf16.msra.mxu1 %v3644_v54  ;;  %v3709_v33 = vld [vmem:[#allocation8 + $0x16c] ss:$16 sps:$4 sm:$0xff]   ;;  %v3736_v54 = vld [vmem:[#allocation8 + $0x204] ss:$16 sps:$4 sm:$0xff]  }
 0x1c7   : > { %1491 = vmatprep.subr.bf16.mxu0 %v3622_v34  ;;  %2228 = vmatprep.subr.bf16.mxu1 %v3652_v56  ;;  %v3704_v34 = vld [vmem:[#allocation8 + $0x160] ss:$16 sps:$4 sm:$0xff]  }
 0x1ca   : > { %1492 = vmatpush1.bf16.msra.mxu0 %v3620_v35  ;;  %2229 = vmatpush1.bf16.msra.mxu1 %v3650_v58  ;;  %v3707_v35 = vld [vmem:[#allocation8 + $0x168] ss:$16 sps:$4 sm:$0xff]  }
 0x1cb   : > { %1493 = vmatprep.subr.bf16.mxu0 %v3625_v37  ;;  %2230 = vmatprep.subr.bf16.mxu1 %v3658_v60  ;;  %v3712_v37 = vld [vmem:[#allocation8 + $0x184] ss:$16 sps:$4 sm:$0xff]  }
 0x1ce   : > { %1494 = vmatpush1.bf16.msra.mxu0 %v3623_v38  ;;  %2231 = vmatpush1.bf16.msra.mxu1 %v3656_v62  ;;  %v3715_v38 = vld [vmem:[#allocation8 + $0x18c] ss:$16 sps:$4 sm:$0xff]   ;;  %v899_v62 = vld [vmem:[%s4520_s4] sm:$0x7] }
 0x1cf   : > { %1495 = vmatprep.subr.bf16.mxu0 %v3628_v40  ;;  %2232 = vmatprep.subr.bf16.mxu1 %v3664_v1  ;;  %v3710_v40 = vld [vmem:[#allocation8 + $0x180] ss:$16 sps:$4 sm:$0xff]  }
 0x1d2   : > { %1496 = vmatpush1.bf16.msra.mxu0 %v3626_v41  ;;  %2233 = vmatpush1.bf16.msra.mxu1 %v3662_v3  ;;  %v3713_v41 = vld [vmem:[#allocation8 + $0x188] ss:$16 sps:$4 sm:$0xff]  }
 0x1d3   : > { %1497 = vmatprep.subr.bf16.mxu0 %v3631_v42  ;;  %2234 = vmatprep.subr.bf16.mxu1 %v3670_v5  ;;  %v3718_v42 = vld [vmem:[#allocation8 + $0x1a4] ss:$16 sps:$4 sm:$0xff]  }
 0x1d6   : > { %1498 = vmatpush1.bf16.msra.mxu0 %v3629_v43  ;;  %v3721_v43 = vld [vmem:[#allocation8 + $0x1ac] ss:$16 sps:$4 sm:$0xff]  }
 0x1d7   : > { %1499 = vmatprep.subr.bf16.mxu0 %v3634_v44  ;;  %v3716_v44 = vld [vmem:[#allocation8 + $0x1a0] ss:$16 sps:$4 sm:$0xff]  }
 0x1da   : > { %1500 = vmatpush1.bf16.msra.mxu0 %v3632_v45  ;;  %v3719_v45 = vld [vmem:[#allocation8 + $0x1a8] ss:$16 sps:$4 sm:$0xff]  }
 0x1db   : > { %1501 = vmatprep.subr.bf16.mxu0 %v3637_v46  ;;  %v3724_v46 = vld [vmem:[#allocation8 + $0x1c4] ss:$16 sps:$4 sm:$0xff]  }
 0x1de   : > { %1502 = vmatpush1.bf16.msra.mxu0 %v3635_v47  ;;  %v3727_v47 = vld [vmem:[#allocation8 + $0x1cc] ss:$16 sps:$4 sm:$0xff]  }
 0x1df   : > { %2310 = vmatprep.subr.bf16.mxu0 %v3643_v51  ;;  %v3733_v51 = vld [vmem:[#allocation8 + $0x1ec] ss:$16 sps:$4 sm:$0xff]  }
 0x1e1   : > { %1504 = vmatmul.mubr.bf16.vlgmr.msra.gmra.mrb[4].mxu0 %v4397_v7  ;;  %v3668_v7 = vld [vmem:[#allocation8 + $0xa0] ss:$16 sps:$4 sm:$0xff]  }
 0x1e2   : > { %2311 = vmatpush1.bf16.msra.mxu0 %v3641_v50  ;;  %2235 = vmatpush1.bf16.msra.mxu1 %v3668_v7  ;;  %v3730_v50 = vld [vmem:[#allocation8 + $0x1e4] ss:$16 sps:$4 sm:$0xff]  }
 0x1e3   : > { %2312 = vmatprep.subr.bf16.mxu0 %v3649_v53  ;;  %2236 = vmatprep.subr.bf16.mxu1 %v3676_v9  ;;  %v3731_v53 = vld [vmem:[#allocation8 + $0x1e8] ss:$16 sps:$4 sm:$0xff]  }
 0x1e6   : > { %2313 = vmatpush1.bf16.msra.mxu0 %v3647_v55  ;;  %2237 = vmatpush1.bf16.msra.mxu1 %v3674_v11  ;;  %v3739_v55 = vld [vmem:[#allocation8 + $0x20c] ss:$16 sps:$4 sm:$0xff]  }
 0x1e7   : > { %2314 = vmatprep.subr.bf16.mxu0 %v3655_v57  ;;  %2238 = vmatprep.subr.bf16.mxu1 %v3682_v13 }
 0x1ea   : > { %2315 = vmatpush1.bf16.msra.mxu0 %v3653_v59  ;;  %2239 = vmatpush1.bf16.msra.mxu1 %v3680_v15 }
 0x1eb   : > { %2316 = vmatprep.subr.bf16.mxu0 %v3661_v61  ;;  %2240 = vmatprep.subr.bf16.mxu1 %v3688_v17  ;;  %v908_v17 = vrot.slane %v899_v62, %v4386_v25 }
 0x1ee   : > { %2317 = vmatpush1.bf16.msra.mxu0 %v3659_v63  ;;  %2241 = vmatpush1.bf16.msra.mxu1 %v3686_v19  ;;  %v912_v63 = vrot.slane %v899_v62, %v4391_v36 }
 0x1ef   : > { %2318 = vmatprep.subr.bf16.mxu0 %v3667_v2  ;;  %2242 = vmatprep.subr.bf16.mxu1 %v3694_v24 }
 0x1f2   : > { %2319 = vmatpush1.bf16.msra.mxu0 %v3665_v4  ;;  %2243 = vmatpush1.bf16.msra.mxu1 %v3692_v21 }
 0x1f3   : > { %2320 = vmatprep.subr.bf16.mxu0 %v3673_v6  ;;  %2244 = vmatprep.subr.bf16.mxu1 %v3700_v28 }
 0x1f6   : > { %2321 = vmatpush1.bf16.msra.mxu0 %v3671_v8  ;;  %2245 = vmatpush1.bf16.msra.mxu1 %v3698_v30 }
 0x1f7   : > { %2322 = vmatprep.subr.bf16.mxu0 %v3679_v10  ;;  %2246 = vmatprep.subr.bf16.mxu1 %v3706_v32 }
 0x1fa   : > { %2323 = vmatpush1.bf16.msra.mxu0 %v3677_v12  ;;  %2247 = vmatpush1.bf16.msra.mxu1 %v3704_v34 }
 0x1fb   : > { %2324 = vmatprep.subr.bf16.mxu0 %v3685_v14  ;;  %2248 = vmatprep.subr.bf16.mxu1 %v3712_v37 }
 0x1fe   : > { %2325 = vmatpush1.bf16.msra.mxu0 %v3683_v16  ;;  %2249 = vmatpush1.bf16.msra.mxu1 %v3710_v40  ;;  %v904_v16 = vrot.slane %v899_v62, %v4380_v23  ;;  %v3737_v40 = vld [vmem:[#allocation8 + $0x208] ss:$16 sps:$4 sm:$0xff]   ;;  %v3770_v62 = vld [vmem:[#allocation8 + $0x2c0] ss:$16 sps:$4 sm:$0xff]  }
 0x1ff   : > { %2326 = vmatprep.subr.bf16.mxu0 %v3691_v18  ;;  %2250 = vmatprep.subr.bf16.mxu1 %v3718_v42  ;;  %v3745_v42 = vld [vmem:[#allocation8 + $0x22c] ss:$16 sps:$4 sm:$0xff]  }
 0x202   : > { %2327 = vmatpush1.bf16.msra.mxu0 %v3689_v20  ;;  %2251 = vmatpush1.bf16.msra.mxu1 %v3716_v44  ;;  %v3743_v44 = vld [vmem:[#allocation8 + $0x228] ss:$16 sps:$4 sm:$0xff]  }
 0x203   : > { %2328 = vmatprep.subr.bf16.mxu0 %v3697_v27  ;;  %2252 = vmatprep.subr.bf16.mxu1 %v3724_v46  ;;  %v3751_v46 = vld [vmem:[#allocation8 + $0x24c] ss:$16 sps:$4 sm:$0xff]  }
 0x206   : > { %2329 = vmatpush1.bf16.msra.mxu0 %v3695_v26  ;;  %2253 = vmatpush1.bf16.msra.mxu1 %v3722_v48  ;;  %v3749_v48 = vld [vmem:[#allocation8 + $0x248] ss:$16 sps:$4 sm:$0xff]  }
 0x207   : > { %2330 = vmatprep.subr.bf16.mxu0 %v3703_v29  ;;  %2254 = vmatprep.subr.bf16.mxu1 %v3730_v50  ;;  %v3757_v50 = vld [vmem:[#allocation8 + $0x26c] ss:$16 sps:$4 sm:$0xff]  }
 0x20a   : > { %2331 = vmatpush1.bf16.msra.mxu0 %v3701_v31  ;;  %2255 = vmatpush1.bf16.msra.mxu1 %v3728_v52  ;;  %v3755_v52 = vld [vmem:[#allocation8 + $0x268] ss:$16 sps:$4 sm:$0xff]  }
 0x20b   : > { %2332 = vmatprep.subr.bf16.mxu0 %v3709_v33  ;;  %2267 = vmatprep.subr.bf16.mxu1 %v3736_v54  ;;  %v3763_v54 = vld [vmem:[#allocation8 + $0x28c] ss:$16 sps:$4 sm:$0xff]  }
 0x20e   : > { %2333 = vmatpush1.bf16.msra.mxu0 %v3707_v35 }
 0x20f   : > { %2334 = vmatprep.subr.bf16.mxu0 %v3715_v38  ;;  %v3734_v38 = vld [vmem:[#allocation8 + $0x200] ss:$16 sps:$4 sm:$0xff]  }
 0x212   : > { %2335 = vmatpush1.bf16.msra.mxu0 %v3713_v41  ;;  %v3742_v41 = vld [vmem:[#allocation8 + $0x224] ss:$16 sps:$4 sm:$0xff]  }
 0x213   : > { %2336 = vmatprep.subr.bf16.mxu0 %v3721_v43  ;;  %v3740_v43 = vld [vmem:[#allocation8 + $0x220] ss:$16 sps:$4 sm:$0xff]  }
 0x216   : > { %2337 = vmatpush1.bf16.msra.mxu0 %v3719_v45  ;;  %v3748_v45 = vld [vmem:[#allocation8 + $0x244] ss:$16 sps:$4 sm:$0xff]  }
 0x217   : > { %2338 = vmatprep.subr.bf16.mxu0 %v3727_v47  ;;  %v3746_v47 = vld [vmem:[#allocation8 + $0x240] ss:$16 sps:$4 sm:$0xff]  }
 0x21a   : > { %2339 = vmatpush1.bf16.msra.mxu0 %v3725_v49  ;;  %v3754_v49 = vld [vmem:[#allocation8 + $0x264] ss:$16 sps:$4 sm:$0xff]  }
 0x21b   : > { %2340 = vmatprep.subr.bf16.mxu0 %v3733_v51  ;;  %v3752_v51 = vld [vmem:[#allocation8 + $0x260] ss:$16 sps:$4 sm:$0xff]  }
 0x21e   : > { %2341 = vmatpush1.bf16.msra.mxu0 %v3731_v53  ;;  %v3760_v53 = vld [vmem:[#allocation8 + $0x284] ss:$16 sps:$4 sm:$0xff]  }
 0x21f   : > { %2353 = vmatprep.subr.bf16.mxu0 %v3739_v55  ;;  %v3758_v55 = vld [vmem:[#allocation8 + $0x280] ss:$16 sps:$4 sm:$0xff]  }
 0x274   : > { %v3260_v56 = vpop.f32.mrb[4].mxu1 }
 0x275   : > { %v3261_v57 = vpop.f32.mrb[5].mxu1 }
 0x276   : > { %v3262_v58 = vadd.f32 %v3261_v57, %v3260_v56  ;;  %v3263_v59 = vpop.f32.mrb[6].mxu1  ;;  %v3766_v56 = vld [vmem:[#allocation8 + $0x2a4] ss:$16 sps:$4 sm:$0xff]   ;;  %v3769_v57 = vld [vmem:[#allocation8 + $0x2ac] ss:$16 sps:$4 sm:$0xff]  }
 0x277   : > { %v3264_v60 = vpop.f32.mrb[7].mxu1 }
 0x278   : > { %v3265_v61 = vadd.f32 %v3264_v60, %v3263_v59  ;;  %v1549_v3 = vadd.f32 %v3262_v58, %v912_v63  ;;  %v3764_v58 = vld [vmem:[#allocation8 + $0x2a0] ss:$16 sps:$4 sm:$0xff]   ;;  %v3767_v59 = vld [vmem:[#allocation8 + $0x2a8] ss:$16 sps:$4 sm:$0xff]   ;;  %v3772_v60 = vld [vmem:[#allocation8 + $0x2c4] ss:$16 sps:$4 sm:$0xff]  }
 0x27a   : > { %v1552_v7 = vadd.f32 %v3265_v61, %v912_v63  ;;  %v3775_v61 = vld [vmem:[#allocation8 + $0x2cc] ss:$16 sps:$4 sm:$0xff]   ;;  %v3773_v63 = vld [vmem:[#allocation8 + $0x2c8] ss:$16 sps:$4 sm:$0xff]  }
 0x294   : > { %v3282_v1 = vpop.f32.mrb[8].mxu1 }
 0x295   : > { %v3283_v2 = vpop.f32.mrb[9].mxu1 }
 0x296   : > { %v3284_v4 = vadd.f32 %v3283_v2, %v3282_v1  ;;  %v3285_v5 = vpop.f32.mrb[10].mxu1  ;;  %v3778_v1 = vld [vmem:[#allocation8 + $0x2e4] ss:$16 sps:$4 sm:$0xff]   ;;  %v3781_v2 = vld [vmem:[#allocation8 + $0x2ec] ss:$16 sps:$4 sm:$0xff]  }
 0x297   : > { %v3286_v6 = vpop.f32.mrb[11].mxu1 }
 0x298   : > { %v1590_v8 = vadd.f32 %v3284_v4, %v1549_v3  ;;  %v3287_v9 = vadd.f32 %v3286_v6, %v3285_v5  ;;  %v3776_v3 = vld [vmem:[#allocation8 + $0x2e0] ss:$16 sps:$4 sm:$0xff]   ;;  %v3779_v4 = vld [vmem:[#allocation8 + $0x2e8] ss:$16 sps:$4 sm:$0xff]  }
 0x299   : > { %v3782_v5 = vld [vmem:[#allocation10 + $0x40] sm:$0xff]  }
 0x29a   : > { %v1598_v10 = vmax.f32 %v1590_v8, 0.0  ;;  %v1593_v11 = vadd.f32 %v3287_v9, %v1552_v7  ;;  %v3783_v6 = vld [vmem:[#allocation10] sm:$0xff]   ;;  %v3784_v7 = vld [vmem:[#allocation10 + $0x48] sm:$0xff]   ;;  %v3786_v9 = vld [vmem:[#allocation10 + $0x50] sm:$0xff]  }
 0x29b   : > { %v3785_v8 = vld [vmem:[#allocation10 + $0x8] sm:$0xff]  }
 0x29c   : > { %v3233_v12 = vpack.c.bf16 %v1598_v10, %v1598_v10  ;;  %v1601_v13 = vmax.f32 %v1593_v11, 0.0  ;;  %v3788_v11 = vld [vmem:[#allocation10 + $0x58] sm:$0xff]  }
 0x29e   : > { %1623 = vst [vmem:[%s4406_s30 + $0x8] sm:$0xf] %v3233_v12  ;;  %v4409_v14 = vpack.c.bf16 %v1601_v13, %v1598_v10  ;;  %v3235_v15 = vpack.c.bf16 %v1601_v13, %v1601_v13  ;;  %v3787_v10 = vld [vmem:[#allocation10 + $0x10] sm:$0xff]   ;;  %v3789_v12 = vld [vmem:[#allocation10 + $0x18] sm:$0xff]   ;;  %v3790_v13 = vld [vmem:[#allocation10 + $0x60] sm:$0xff]  }
 0x2a0   : > { %1625 = vst [vmem:[%s4406_s30 + $0x14] sm:$0xf] %v3235_v15  ;;  %v3791_v15 = vld [vmem:[#allocation10 + $0x20] sm:$0xff]  }
 0x2b4   : > { %v1505_v18 = vpop.f32.mrb[4].mxu0 }
 0x2b5   : > { %v3332_v19 = vadd.f32 %v1505_v18, %v904_v16  ;;  %v1507_v20 = vpop.f32.mrb[5].mxu0  ;;  %v3795_v18 = vld [vmem:[#allocation10 + $0x30] sm:$0xff]  }
 0x2b6   : > { %v3333_v21 = vadd.f32 %v1507_v20, %v908_v17  ;;  %v1509_v24 = vpop.f32.mrb[6].mxu0  ;;  %v3797_v20 = vld [vmem:[#allocation10 + $0x38] sm:$0xff]  }
 0x2b7   : > { %v1596_v26 = vmax.f32 %v3332_v19, 0.0  ;;  %v3334_v27 = vadd.f32 %v1509_v24, %v904_v16  ;;  %v1511_v28 = vpop.f32.mrb[7].mxu0  ;;  %v3792_v16 = vld [vmem:[#allocation10 + $0x68] sm:$0xff]   ;;  %v3796_v19 = vld [vmem:[#allocation10 + $0x78] sm:$0xff]   ;;  %v1722_v24 = vld [vmem:[%s4522_s6] sm:$0xf] }
 0x2b8   : > { %v1597_v29 = vmax.f32 %v3333_v21, 0.0  ;;  %v3335_v30 = vadd.f32 %v1511_v28, %v908_v17  ;;  %v3793_v17 = vld [vmem:[#allocation10 + $0x28] sm:$0xff]   ;;  %v3798_v21 = vld [vmem:[#allocation10 + $0xc0] sm:$0xff]   ;;  %v1731_v28 = vrot.slane %v1722_v24, %v4386_v25 }
 0x2b9   : > { %v1599_v31 = vmax.f32 %v3334_v27, 0.0  ;;  %v1735_v27 = vrot.slane %v1722_v24, %v4391_v36 }
 0x2ba   : > { %v3232_v32 = vpack.c.bf16 %v1597_v29, %v1596_v26  ;;  %v1600_v33 = vmax.f32 %v3335_v30, 0.0 }
 0x2bb   : > { %v1602_v34 = vpack.c.bf16 %v1599_v31, %v1596_v26  ;;  %v1727_v26 = vrot.slane %v1722_v24, %v4380_v23 }
 0x2bc   : > { %1622 = vst [vmem:[%s4406_s30] sm:$0xff] %v3232_v32  ;;  %v1603_v35 = vpack.c.bf16 %v1600_v33, %v1597_v29  ;;  %v3234_v37 = vpack.c.bf16 %v1600_v33, %v1599_v31  ;;  %v1739_v29 = vrot.slane %v1722_v24, %v501_v39 }
 0x2be   : > { %1624 = vst [vmem:[%s4406_s30 + $0xc] sm:$0xff] %v3234_v37  ;;  %2256 = vmatprep.mubr.bf16.mxu1 %v1603_v35  ;;  %2342 = vmatprep.mubr.bf16.mxu0 %v1603_v35 }
 0x2bf   : > { %2257 = vmatmul.mubr.bf16.vlgmr.msra.gmra.mrb[12].mxu1 %v1602_v34  ;;  %2343 = vmatmul.mubr.bf16.vlgmr.msra.gmra.mrb[8].mxu0 %v1602_v34 }
 0x2c0   : > { %2268 = vmatpush1.bf16.msra.mxu1 %v3734_v38  ;;  %2354 = vmatpush1.bf16.msra.mxu0 %v3737_v40 }
 0x2c1   : > { %2269 = vmatprep.subr.bf16.mxu1 %v3742_v41  ;;  %2355 = vmatprep.subr.bf16.mxu0 %v3745_v42 }
 0x2c2   : > { %2299 = vmatprep.mubr.bf16.mxu1 %v4075_v0  ;;  %2385 = vmatprep.mubr.bf16.mxu0 %v4075_v0  ;;  %v3761_v0 = vld [vmem:[#allocation8 + $0x288] ss:$16 sps:$4 sm:$0xff]  }
 0x2c4   : > { %2270 = vmatpush1.bf16.msra.mxu1 %v3740_v43  ;;  %2356 = vmatpush1.bf16.msra.mxu0 %v3743_v44 }
 0x2c5   : > { %2271 = vmatprep.subr.bf16.mxu1 %v3748_v45  ;;  %2357 = vmatprep.subr.bf16.mxu0 %v3751_v46 }
 0x2c8   : > { %2272 = vmatpush1.bf16.msra.mxu1 %v3746_v47  ;;  %2358 = vmatpush1.bf16.msra.mxu0 %v3749_v48 }
 0x2c9   : > { %2273 = vmatprep.subr.bf16.mxu1 %v3754_v49  ;;  %2359 = vmatprep.subr.bf16.mxu0 %v3757_v50 }
 0x2cc   : > { %2274 = vmatpush1.bf16.msra.mxu1 %v3752_v51  ;;  %2360 = vmatpush1.bf16.msra.mxu0 %v3755_v52 }
 0x2cd   : > { %2275 = vmatprep.subr.bf16.mxu1 %v3760_v53  ;;  %2361 = vmatprep.subr.bf16.mxu0 %v3763_v54 }
 0x2d0   : > { %2276 = vmatpush1.bf16.msra.mxu1 %v3758_v55  ;;  %2362 = vmatpush1.bf16.msra.mxu0 %v3761_v0  ;;  %v3799_v55 = vld [vmem:[#allocation10 + $0x80] sm:$0xff]   ;;  %v3800_v0 = vld [vmem:[#allocation10 + $0xc8] sm:$0xff]  }
 0x2d1   : > { %2277 = vmatprep.subr.bf16.mxu1 %v3766_v56  ;;  %2363 = vmatprep.subr.bf16.mxu0 %v3769_v57  ;;  %v3801_v56 = vld [vmem:[#allocation10 + $0x88] sm:$0xff]   ;;  %v3802_v57 = vld [vmem:[#allocation10 + $0xd0] sm:$0xff]  }
 0x2d4   : > { %2278 = vmatpush1.bf16.msra.mxu1 %v3764_v58  ;;  %2364 = vmatpush1.bf16.msra.mxu0 %v3767_v59  ;;  %v3803_v58 = vld [vmem:[#allocation10 + $0x90] sm:$0xff]   ;;  %v3804_v59 = vld [vmem:[#allocation10 + $0xd8] sm:$0xff]  }
 0x2d5   : > { %2279 = vmatprep.subr.bf16.mxu1 %v3772_v60  ;;  %2365 = vmatprep.subr.bf16.mxu0 %v3775_v61  ;;  %v3805_v60 = vld [vmem:[#allocation10 + $0x98] sm:$0xff]   ;;  %v3806_v61 = vld [vmem:[#allocation10 + $0xe0] sm:$0xff]  }
 0x2d8   : > { %2280 = vmatpush1.bf16.msra.mxu1 %v3770_v62  ;;  %2366 = vmatpush1.bf16.msra.mxu0 %v3773_v63  ;;  %v3807_v62 = vld [vmem:[#allocation10 + $0xa0] sm:$0xff]   ;;  %v3808_v63 = vld [vmem:[#allocation10 + $0xe8] sm:$0xff]  }
 0x2d9   : > { %2281 = vmatprep.subr.bf16.mxu1 %v3778_v1  ;;  %2367 = vmatprep.subr.bf16.mxu0 %v3781_v2  ;;  %v3809_v1 = vld [vmem:[#allocation10 + $0xa8] sm:$0xff]   ;;  %v3810_v2 = vld [vmem:[#allocation10 + $0xf0] sm:$0xff]  }
 0x2dc   : > { %2282 = vmatpush1.bf16.msra.mxu1 %v3776_v3  ;;  %2368 = vmatpush1.bf16.msra.mxu0 %v3779_v4  ;;  %v3811_v3 = vld [vmem:[#allocation10 + $0xb0] sm:$0xff]   ;;  %v3812_v4 = vld [vmem:[#allocation10 + $0xf8] sm:$0xff]  }
 0x2dd   : > { %3288 = vmatprep.subr.bf16.mxu1 %v3782_v5  ;;  %v3813_v5 = vld [vmem:[#allocation10 + $0xb8] sm:$0xff]  }
 0x2df   : > { %2300 = vmatmul.mubr.bf16.vlgmr.msra.gmra.mrb[12].mxu1 %v4409_v14  ;;  %2386 = vmatmul.mubr.bf16.vlgmr.msra.gmra.mrb[8].mxu0 %v4409_v14  ;;  %v3794_v14 = vld [vmem:[#allocation10 + $0x70] sm:$0xff]  }
 0x2e0   : > { %3289 = vmatpush3.bf16.msra.mxu1 %v3783_v6 }
 0x2e1   : > { %3290 = vmatprep.subr.bf16.mxu1 %v3784_v7 }
 0x2e4   : > { %3291 = vmatpush3.bf16.msra.mxu1 %v3785_v8 }
 0x2e5   : > { %3292 = vmatprep.subr.bf16.mxu1 %v3786_v9 }
 0x2e8   : > { %3293 = vmatpush3.bf16.msra.mxu1 %v3787_v10 }
 0x2e9   : > { %3294 = vmatprep.subr.bf16.mxu1 %v3788_v11 }
 0x2ec   : > { %3295 = vmatpush3.bf16.msra.mxu1 %v3789_v12 }
 0x2ed   : > { %3296 = vmatprep.subr.bf16.mxu1 %v3790_v13 }
 0x2f0   : > { %3297 = vmatpush3.bf16.msra.mxu1 %v3791_v15 }
 0x2f1   : > { %3298 = vmatprep.subr.bf16.mxu1 %v3792_v16 }
 0x2f4   : > { %3299 = vmatpush3.bf16.msra.mxu1 %v3793_v17 }
 0x2f5   : > { %3300 = vmatprep.subr.bf16.mxu1 %v3794_v14 }
 0x2f8   : > { %3301 = vmatpush3.bf16.msra.mxu1 %v3795_v18 }
 0x2f9   : > { %3302 = vmatprep.subr.bf16.mxu1 %v3796_v19 }
 0x2fc   : > { %3303 = vmatpush3.bf16.msra.mxu1 %v3797_v20 }
 0x2fd   : > { %3310 = vmatprep.subr.bf16.mxu1 %v3798_v21 }
 0x3b2   : > { %v2301_v30 = vpop.f32.mrb[12].mxu1  ;;  %v2387_v31 = vpop.f32.mrb[8].mxu0 }
 0x3b3   : > { %v3336_v32 = vadd.f32 %v2301_v30, %v1727_v26  ;;  %v3340_v33 = vadd.f32 %v2387_v31, %v1735_v27  ;;  %v2303_v34 = vpop.f32.mrb[13].mxu1  ;;  %v2389_v35 = vpop.f32.mrb[9].mxu0 }
 0x3b4   : > { %v3337_v37 = vadd.f32 %v2303_v34, %v1731_v28  ;;  %v3341_v38 = vadd.f32 %v2389_v35, %v1739_v29  ;;  %v2305_v40 = vpop.f32.mrb[14].mxu1  ;;  %v2391_v41 = vpop.f32.mrb[10].mxu0 }
 0x3b5   : > { %v3338_v42 = vadd.f32 %v2305_v40, %v1727_v26  ;;  %v3342_v43 = vadd.f32 %v2391_v41, %v1735_v27  ;;  %v2307_v23 = vpop.f32.mrb[15].mxu1  ;;  %v2393_v44 = vpop.f32.mrb[11].mxu0  ;;  %v2396_v25 = vmax.f32 %v3336_v32, 0.0  ;;  %v2398_v46 = vmax.f32 %v3340_v33, 0.0 }
 0x3b6   : > { %v3339_v36 = vadd.f32 %v2307_v23, %v1731_v28  ;;  %v3343_v45 = vadd.f32 %v2393_v44, %v1739_v29  ;;  %v2397_v47 = vmax.f32 %v3337_v37, 0.0  ;;  %v2399_v48 = vmax.f32 %v3341_v38, 0.0 }
 0x3b7   : > { %v2400_v22 = vmax.f32 %v3338_v42, 0.0  ;;  %v2402_v39 = vmax.f32 %v3342_v43, 0.0 }
 0x3b8   : > { %v2401_v49 = vmax.f32 %v3339_v36, 0.0  ;;  %v2403_v50 = vmax.f32 %v3343_v45, 0.0 }
 0x3b9   : > { %v2404_v51 = vpack.c.bf16 %v2400_v22, %v2396_v25  ;;  %v2406_v52 = vpack.c.bf16 %v2402_v39, %v2398_v46 }
 0x3ba   : > { %v2405_v53 = vpack.c.bf16 %v2401_v49, %v2397_v47  ;;  %v2407_v54 = vpack.c.bf16 %v2403_v50, %v2399_v48 }
 0x3bc   : > { %2703 = vmatprep.mubr.bf16.mxu1 %v2405_v53 }
 0x3bd   : > { %2704 = vmatmul.mubr.bf16.vlgmr.msra.gmra.mrb[16].mxu1 %v2404_v51 }
 0x3be   : > { %3311 = vmatpush3.bf16.msra.mxu1 %v3799_v55  ;;  %2744 = vmatprep.mubr.bf16.mxu1 %v2407_v54 }
 0x3bf   : > { %3312 = vmatprep.subr.bf16.mxu1 %v3800_v0 }
 0x3c2   : > { %3313 = vmatpush3.bf16.msra.mxu1 %v3801_v56 }
 0x3c3   : > { %3314 = vmatprep.subr.bf16.mxu1 %v3802_v57 }
 0x3c6   : > { %3315 = vmatpush3.bf16.msra.mxu1 %v3803_v58 }
 0x3c7   : > { %3316 = vmatprep.subr.bf16.mxu1 %v3804_v59 }
 0x3ca   : > { %3317 = vmatpush3.bf16.msra.mxu1 %v3805_v60 }
 0x3cb   : > { %3318 = vmatprep.subr.bf16.mxu1 %v3806_v61 }
 0x3ce   : > { %3319 = vmatpush3.bf16.msra.mxu1 %v3807_v62 }
 0x3cf   : > { %3320 = vmatprep.subr.bf16.mxu1 %v3808_v63 }
 0x3d2   : > { %3321 = vmatpush3.bf16.msra.mxu1 %v3809_v1 }
 0x3d3   : > { %3322 = vmatprep.subr.bf16.mxu1 %v3810_v2 }
 0x3d6   : > { %3323 = vmatpush3.bf16.msra.mxu1 %v3811_v3 }
 0x3d7   : > { %3324 = vmatprep.subr.bf16.mxu1 %v3812_v4 }
 0x3da   : > { %3325 = vmatpush3.bf16.msra.mxu1 %v3813_v5 }
 0x3dd   : > { %2745 = vmatmul.mubr.bf16.vlgmr.msra.gmra.mrb[20].mxu1 %v2406_v52 }
 0x3de   : > { %3969 = shalt.err (!%p3966_p13)
}
 0x3df   : > { %s3970_s30 = scalar_lea.hbm %s4435_s11, 384  ;;  %s3974_s13 = scalar_lea.hbm %s4525_s9, 768 }
 0x3e0   : > { %p3971_p9 = scmp.ne.s32.totalorder %s4435_s11, %s3970_s30  ;;  %p3975_p4 = scmp.lt.u32.totalorder %s4435_s11, %s4525_s9 }
 0x3e1   : > { %p3976_p8 = scmp.lt.u32.totalorder %s3974_s13, %s3970_s30  ;;  %p3978_p10 = scmp.lt.u32.totalorder %s3970_s30, %s4435_s11 }
 0x3e2   : > { %p3972_p0 = pnand %p3971_p9, %p4302_p3 }
 0x3e3   : > { %p3977_p6 = por %p3976_p8, %p3975_p4 }
 0x3e4   : > { %p3973_p11 = pneg %p3972_p0 }
 0x3e5   : > { %p3979_p5 = por %p3978_p10, %p3977_p6 }
 0x3e7   : > { %p3980_p7 = pnand %p3979_p5, %p3973_p11 }
 0x3e9   : > { %3983 = shalt.err (!%p3980_p7)
}
 0x3ea   : > { %s4077_s21 = smov 192   ;;  %s4078_s26 = smov 12  }
 0x3eb   : > { %3376 = dma.vmem_to_hbm [thread:$0]  (%p4302_p3), %s4430_s25, 384, %s4435_s11, %s2764_s19, %s4077_s21, %s4077_s21, %s4078_s26  }
 0x3ec   : > { %s4551_s30 = sld [smem:[#allocation21_spill]]  ;;  %s3238_s25 = sshll.u32 %s4158_s17, 7 }
 0x3ed   : > { %s446_s11 = scalar_lea.vmem [#allocation12], %s2953_s27  ;;  %s4552_s13 = sld [smem:[#allocation22_spill]] }
 0x3ee   : > { %s2799_s19 = sshll.u32 %s446_s11, 4  ;;  %s2769_s21 = scalar_lea.sflag [#allocation13], %s4354_s20  ;;  %s4472_s19 = int_to_ptr.vmem [resolvable:$true] %s2799_s19 }
 0x3ef   : > { %s3984_s26 = scalar_lea.vmem %s4472_s19, 128  ;;  %s4079_s17 = smov [#allocation12]  }
 0x3f0   : > { %p3985_p12 = scmp.ne.s32.totalorder %s4472_s19, %s3984_s26  ;;  %s3988_s27 = sshll.u32 %s4079_s17, 4  ;;  %s3989_s27 = int_to_ptr.vmem [resolvable:$false] %s3988_s27 }
 0x3f1   : > { %s3990_s22 = scalar_lea.vmem %s3989_s27, 256  ;;  %p3991_p13 = scmp.lt.s32.totalorder %s4472_s19, %s3989_s27 }
 0x3f2   : > { %v3188_v12 = vld [vmem:[%s4551_s30] ss:$0 sm:$0xff]  ;;  %p3986_p2 = pnand %p3985_p12, %p4302_p3  ;;  %p3992_p9 = scmp.lt.s32.totalorder %s3990_s22, %s3984_s26 }
 0x3f3   : > { %s4553_s29 = smov %s4552_s13  ;;  %s4470_s28 = scalar_lea.hbm %s4552_s13, %s3238_s25 }
 0x3f4   : > { %p3987_p1 = pneg %p3986_p2  ;;  %p3993_p0 = por %p3992_p9, %p3991_p13 }
 0x3f6   : > { %p3994_p11 = pnand %p3993_p0, %p3987_p1 }
 0x490   : > { %v3304_v6 = vpop.f32.mrb[16].mxu1 }
 0x491   : > { %v3305_v7 = vpop.f32.mrb[17].mxu1 }
 0x492   : > { %v3306_v8 = vadd.f32 %v3305_v7, %v3304_v6  ;;  %v3307_v9 = vpop.f32.mrb[18].mxu1 }
 0x493   : > { %v3308_v10 = vpop.f32.mrb[19].mxu1 }
 0x494   : > { %v3309_v11 = vadd.f32 %v3308_v10, %v3307_v9  ;;  %v2706_v16 = vadd.f32 %v3306_v8, %v3188_v12 }
 0x496   : > { %v2709_v19 = vadd.f32 %v3309_v11, %v3188_v12 }
 0x4b0   : > { %v3326_v13 = vpop.f32.mrb[20].mxu1 }
 0x4b1   : > { %v3327_v15 = vpop.f32.mrb[21].mxu1 }
 0x4b2   : > { %v3328_v17 = vadd.f32 %v3327_v15, %v3326_v13  ;;  %v3329_v14 = vpop.f32.mrb[22].mxu1 }
 0x4b3   : > { %v3330_v18 = vpop.f32.mrb[23].mxu1 }
 0x4b4   : > { %v2747_v20 = vadd.f32 %v3328_v17, %v2706_v16  ;;  %v3331_v21 = vadd.f32 %v3330_v18, %v3329_v14 }
 0x4b6   : > { %v2750_v24 = vadd.f32 %v3331_v21, %v2709_v19 }
 0x4b8   : > { %v3242_v26 = vpack.c.bf16 %v2750_v24, %v2747_v20 }
 0x4ba   : > { %3243 = vst [vmem:[%s446_s11] sm:$0xff] %v3242_v26  }
 0x4bb   : > { %3997 = shalt.err (!%p3994_p11)
}
 0x4bc   : > { %s3998_s23 = scalar_lea.hbm %s4470_s28, 128  ;;  %s4002_s11 = scalar_lea.hbm %s4553_s29, 256 }
 0x4bd   : > { %p3999_p4 = scmp.ne.s32.totalorder %s4470_s28, %s3998_s23  ;;  %p4003_p10 = scmp.lt.u32.totalorder %s4470_s28, %s4553_s29 }
 0x4be   : > { %p4004_p5 = scmp.lt.u32.totalorder %s4002_s11, %s3998_s23  ;;  %p4006_p12 = scmp.lt.u32.totalorder %s3998_s23, %s4470_s28 }
 0x4bf   : > { %p4000_p8 = pnand %p3999_p4, %p4302_p3 }
 0x4c0   : > { %p4005_p7 = por %p4004_p5, %p4003_p10 }
 0x4c1   : > { %p4001_p6 = pneg %p4000_p8 }
 0x4c2   : > { %p4007_p2 = por %p4006_p12, %p4005_p7 }
 0x4c4   : > { %p4008_p1 = pnand %p4007_p2, %p4001_p6 }
 0x4c6   : > { %4011 = shalt.err (!%p4008_p1)
}
 0x4c7   : > { %s4080_s13 = smov 64   ;;  %s4081_s26 = smov 4  }
 0x4c8   : > { %3377 = dma.vmem_to_hbm [thread:$0]  (%p4302_p3), %s4472_s19, 128, %s4470_s28, %s2769_s21, %s4080_s13, %s4080_s13, %s4081_s26  }
 0x4c9 PF: > { %s4554_s17 = sld [smem:[#allocation19_spill]]  ;;  %s4555_s27 = sld [smem:[#allocation20_spill]] }
 0x4ca   : > { %p4557_p9 = scmp.ge.s32.totalorder %s4062_s16, 2 }
 0x4cf   : > { %s2814_s22 = sand.u32 1, %s4554_s17   ;;  %p4556_p13 = scmp.ne.s32.totalorder %s4555_s27, 0 }
 0x4d0   : > { %s2815_s23 = scalar_lea.sflag [#allocation4], %s2814_s22 }
 0x4d1   : > { %p3398_p0 = pnand %p4557_p9, %p4556_p13 }
 0x4d3   : > { %4041 = dma.done.wait (!%p3398_p0), %s2815_s23, 384  }
 0x4d4   : > { %4043 = vsyncadd (!%p3398_p0), %s2815_s23, 4294966912  ;;  %s2824_s30 = scalar_lea.sflag [#allocation13], %s2814_s22 }
 0x4d5   : > { %4045 = dma.done.wait (!%p3398_p0), %s2824_s30, 128  }
 0x4d6   : > { %4047 = vsyncadd (!%p3398_p0), %s2824_s30, 4294967168  ;;  %p29_p3 = scmp.ge.s32.totalorder %s4289_s8, 4   ;;  %s4558_s13 = smov %s4054_s14 }
 0x4d7   : > { %s4559_s14 = smov %s4058_s15  ;;  %s4560_s15 = smov %s4298_s12 }
 0x4d8   : > { %s4561_s16 = smov %s4289_s8  ;;  %31 = sbr.rel (!%p29_p3) target bundleno = 12 (0xc), region = 134 }
 0x4df   :  { %2829 = vsyncpa [#allocation3], 1 }
 0x4e0   :  { %2831 = vsyncpa [#allocation3 + $0x1], 1 }
 0x4e1   :  { %2832 = vsyncpa [#allocation6], 1 }
 0x4e2   :  { %2833 = vsyncpa [#allocation9], 1 }
 0x4e3   :  { %2834 = vsyncpa [#allocation4], 1 }
 0x4e4   :  { %2836 = vsyncpa [#allocation4 + $0x1], 1 }
 0x4e5   :  { %2837 = vsyncpa [#allocation13], 1 }
 0x4e6   :  { %2839 = vsyncpa [#allocation13 + $0x1], 1 }

</bundles_post_ra>
